<compile_context>
chip_gen: v6e
topology: v6e:2x2x1
jax: 0.10.0
libtpu: 0.0.40
codegen_flags: <defaults>
</compile_context>

<pallas_src>
import math

import jax
import jax.numpy as jnp
import numpy as np
from jax.experimental import pallas as pl
from jax.experimental.pallas import tpu as pltpu


def _make_flatten_kernel(feat_shape):
    """Kernel copying a (bn, *feat_shape) block into a (bn, prod(feat_shape)) block."""
    *lead, w = feat_shape
    rows = math.prod(lead)  # == 1 when x is already 2-D

    def kernel(x_ref, o_ref):
        # x_ref: (bn, *feat_shape)    o_ref: (bn, rows * w)
        # In-VMEM scatter: each source "row" (last feature axis, w lanes wide)
        # lands at lane offset r*w of the flattened output row.  All HBM
        # traffic (the BlockSpec-generated block reads/writes) stays full,
        # lane-dense blocks; only this VMEM-side shuffle touches sub-128-lane
        # slices, and each piece sits inside a single 128-lane group.
        for r in range(rows):
            idx = tuple(int(i) for i in np.unravel_index(r, lead)) if lead else ()
            o_ref[:, r * w:(r + 1) * w] = x_ref[(slice(None), *idx, slice(None))]

    return kernel


def flatten_layer(x, *, max_block_bytes=4 * 1024 * 1024):
    """Pallas implementation of FlattenLayer.forward: x -> x.reshape(N, -1)."""
    if x.ndim < 2:
        raise ValueError("flatten_layer expects at least 2 dims (batch, ...)")

    n = x.shape[0]
    feat_shape = tuple(x.shape[1:])
    f = math.prod(feat_shape)
    row_bytes = f * x.dtype.itemsize

    # Batch rows per block: as many as fit the per-block budget.  With default
    # double buffering that is ~4 live copies of a block, well under VMEM on
    # all generations (v5e/v6e 128 MiB, v7x 64 MiB physical).
    bn = max(1, min(n, max_block_bytes // max(row_bytes, 1)))
    if bn < n and bn >= 8:
        bn = (bn // 8) * 8  # keep blocks sublane-aligned when the batch is tiled

    grid = (pl.cdiv(n, bn),)
    ndim = x.ndim
    kernel = _make_flatten_kernel(feat_shape)

    return pl.pallas_call(
        kernel,
        out_shape=jax.ShapeDtypeStruct((n, f), x.dtype),
        grid=grid,
        in_specs=[
            pl.BlockSpec((bn,) + feat_shape, lambda i: (i,) + (0,) * (ndim - 1)),
        ],
        out_specs=pl.BlockSpec((bn, f), lambda i: (i, 0)),
        compiler_params=pltpu.CompilerParams(
            dimension_semantics=("parallel",),
            vmem_limit_bytes=48 * 1024 * 1024,
        ),
        cost_estimate=pl.CostEstimate(
            flops=0,
            transcendentals=0,
            bytes_accessed=2 * n * f * x.dtype.itemsize,
        ),
    )(x)


if __name__ == "__main__":
    key = jax.random.PRNGKey(0)
    # batch=2, channels=4, spatial=16x16  ->  output (2, 1024).
    x = jax.random.normal(key, (2, 4, 16, 16), dtype=jnp.float32)

    y = flatten_layer(x)
    y = jax.block_until_ready(y)

    # Reference: plain JAX row-major flatten (== torch x.view(N, -1)).
    ref = x.reshape(x.shape[0], -1)
    assert y.shape == ref.shape, (y.shape, ref.shape)
    assert y.dtype == ref.dtype, (y.dtype, ref.dtype)
    assert bool(jnp.array_equal(y, ref)), "Pallas flatten mismatch vs reference"

    print("KERNEL_OK")
</pallas_src>

<mosaic_0001>
module attributes {stable_mosaic.version = 11 : i64} {
  func.func @kernel(%arg0: i32, %arg1: memref<2x4x16x16xf32, #tpu.memory_space<vmem>>, %arg2: memref<2x1024xf32, #tpu.memory_space<vmem>>) attributes {dimension_semantics = [#tpu.dimension_semantics<parallel>], iteration_bounds = array<i64: 1>, scalar_prefetch = 0 : i64, scratch_operands = 0 : i64, tpu.core_type = #tpu.core_type<tc>, window_params = [{transform_indices = @transform_0, window_bounds = array<i64: 2, 4, 16, 16>}, {transform_indices = @transform_1, window_bounds = array<i64: 2, 1024>}]} {
    %c0 = arith.constant 0 : index
    %c0_0 = arith.constant 0 : index
    %c0_1 = arith.constant 0 : index
    %c0_2 = arith.constant 0 : index
    %0 = vector.load %arg1[%c0, %c0_0, %c0_1, %c0_2] : memref<2x4x16x16xf32, #tpu.memory_space<vmem>>, vector<2x1x1x16xf32>
    %1 = vector.shape_cast %0 : vector<2x1x1x16xf32> to vector<2x16xf32>
    %c0_3 = arith.constant 0 : index
    %c0_4 = arith.constant 0 : index
    %2 = vector.load %arg2[%c0_3, %c0_4] : memref<2x1024xf32, #tpu.memory_space<vmem>>, vector<2x16xf32>
    tpu.vector_store %arg2[%c0_3, %c0_4], %1 {strides = array<i32>} : memref<2x1024xf32, #tpu.memory_space<vmem>>, vector<2x16xf32>,
    %c0_5 = arith.constant 0 : index
    %c0_6 = arith.constant 0 : index
    %c1 = arith.constant 1 : index
    %c0_7 = arith.constant 0 : index
    %3 = vector.load %arg1[%c0_5, %c0_6, %c1, %c0_7] : memref<2x4x16x16xf32, #tpu.memory_space<vmem>>, vector<2x1x1x16xf32>
    %4 = vector.shape_cast %3 : vector<2x1x1x16xf32> to vector<2x16xf32>
    %c0_8 = arith.constant 0 : index
    %c16 = arith.constant 16 : index
    %5 = vector.load %arg2[%c0_8, %c16] : memref<2x1024xf32, #tpu.memory_space<vmem>>, vector<2x16xf32>
    tpu.vector_store %arg2[%c0_8, %c16], %4 {strides = array<i32>} : memref<2x1024xf32, #tpu.memory_space<vmem>>, vector<2x16xf32>,
    %c0_9 = arith.constant 0 : index
    %c0_10 = arith.constant 0 : index
    %c2 = arith.constant 2 : index
    %c0_11 = arith.constant 0 : index
    %6 = vector.load %arg1[%c0_9, %c0_10, %c2, %c0_11] : memref<2x4x16x16xf32, #tpu.memory_space<vmem>>, vector<2x1x1x16xf32>
    %7 = vector.shape_cast %6 : vector<2x1x1x16xf32> to vector<2x16xf32>
    %c0_12 = arith.constant 0 : index
    %c32 = arith.constant 32 : index
    %8 = vector.load %arg2[%c0_12, %c32] : memref<2x1024xf32, #tpu.memory_space<vmem>>, vector<2x16xf32>
    tpu.vector_store %arg2[%c0_12, %c32], %7 {strides = array<i32>} : memref<2x1024xf32, #tpu.memory_space<vmem>>, vector<2x16xf32>,
    %c0_13 = arith.constant 0 : index
    %c0_14 = arith.constant 0 : index
    %c3 = arith.constant 3 : index
    %c0_15 = arith.constant 0 : index
    %9 = vector.load %arg1[%c0_13, %c0_14, %c3, %c0_15] : memref<2x4x16x16xf32, #tpu.memory_space<vmem>>, vector<2x1x1x16xf32>
    %10 = vector.shape_cast %9 : vector<2x1x1x16xf32> to vector<2x16xf32>
    %c0_16 = arith.constant 0 : index
    %c48 = arith.constant 48 : index
    %11 = vector.load %arg2[%c0_16, %c48] : memref<2x1024xf32, #tpu.memory_space<vmem>>, vector<2x16xf32>
    tpu.vector_store %arg2[%c0_16, %c48], %10 {strides = array<i32>} : memref<2x1024xf32, #tpu.memory_space<vmem>>, vector<2x16xf32>,
    %c0_17 = arith.constant 0 : index
    %c0_18 = arith.constant 0 : index
    %c4 = arith.constant 4 : index
    %c0_19 = arith.constant 0 : index
    %12 = vector.load %arg1[%c0_17, %c0_18, %c4, %c0_19] : memref<2x4x16x16xf32, #tpu.memory_space<vmem>>, vector<2x1x1x16xf32>
    %13 = vector.shape_cast %12 : vector<2x1x1x16xf32> to vector<2x16xf32>
    %c0_20 = arith.constant 0 : index
    %c64 = arith.constant 64 : index
    %14 = vector.load %arg2[%c0_20, %c64] : memref<2x1024xf32, #tpu.memory_space<vmem>>, vector<2x16xf32>
    tpu.vector_store %arg2[%c0_20, %c64], %13 {strides = array<i32>} : memref<2x1024xf32, #tpu.memory_space<vmem>>, vector<2x16xf32>,
    %c0_21 = arith.constant 0 : index
    %c0_22 = arith.constant 0 : index
    %c5 = arith.constant 5 : index
    %c0_23 = arith.constant 0 : index
    %15 = vector.load %arg1[%c0_21, %c0_22, %c5, %c0_23] : memref<2x4x16x16xf32, #tpu.memory_space<vmem>>, vector<2x1x1x16xf32>
    %16 = vector.shape_cast %15 : vector<2x1x1x16xf32> to vector<2x16xf32>
    %c0_24 = arith.constant 0 : index
    %c80 = arith.constant 80 : index
    %17 = vector.load %arg2[%c0_24, %c80] : memref<2x1024xf32, #tpu.memory_space<vmem>>, vector<2x16xf32>
    tpu.vector_store %arg2[%c0_24, %c80], %16 {strides = array<i32>} : memref<2x1024xf32, #tpu.memory_space<vmem>>, vector<2x16xf32>,
    %c0_25 = arith.constant 0 : index
    %c0_26 = arith.constant 0 : index
    %c6 = arith.constant 6 : index
    %c0_27 = arith.constant 0 : index
    %18 = vector.load %arg1[%c0_25, %c0_26, %c6, %c0_27] : memref<2x4x16x16xf32, #tpu.memory_space<vmem>>, vector<2x1x1x16xf32>
    %19 = vector.shape_cast %18 : vector<2x1x1x16xf32> to vector<2x16xf32>
    %c0_28 = arith.constant 0 : index
    %c96 = arith.constant 96 : index
    %20 = vector.load %arg2[%c0_28, %c96] : memref<2x1024xf32, #tpu.memory_space<vmem>>, vector<2x16xf32>
    tpu.vector_store %arg2[%c0_28, %c96], %19 {strides = array<i32>} : memref<2x1024xf32, #tpu.memory_space<vmem>>, vector<2x16xf32>,
    %c0_29 = arith.constant 0 : index
    %c0_30 = arith.constant 0 : index
    %c7 = arith.constant 7 : index
    %c0_31 = arith.constant 0 : index
    %21 = vector.load %arg1[%c0_29, %c0_30, %c7, %c0_31] : memref<2x4x16x16xf32, #tpu.memory_space<vmem>>, vector<2x1x1x16xf32>
    %22 = vector.shape_cast %21 : vector<2x1x1x16xf32> to vector<2x16xf32>
    %c0_32 = arith.constant 0 : index
    %c112 = arith.constant 112 : index
    %23 = vector.load %arg2[%c0_32, %c112] : memref<2x1024xf32, #tpu.memory_space<vmem>>, vector<2x16xf32>
    tpu.vector_store %arg2[%c0_32, %c112], %22 {strides = array<i32>} : memref<2x1024xf32, #tpu.memory_space<vmem>>, vector<2x16xf32>,
    %c0_33 = arith.constant 0 : index
    %c0_34 = arith.constant 0 : index
    %c8 = arith.constant 8 : index
    %c0_35 = arith.constant 0 : index
    %24 = vector.load %arg1[%c0_33, %c0_34, %c8, %c0_35] : memref<2x4x16x16xf32, #tpu.memory_space<vmem>>, vector<2x1x1x16xf32>
    %25 = vector.shape_cast %24 : vector<2x1x1x16xf32> to vector<2x16xf32>
    %c0_36 = arith.constant 0 : index
    %c128 = arith.constant 128 : index
    %26 = vector.load %arg2[%c0_36, %c128] : memref<2x1024xf32, #tpu.memory_space<vmem>>, vector<2x16xf32>
    tpu.vector_store %arg2[%c0_36, %c128], %25 {strides = array<i32>} : memref<2x1024xf32, #tpu.memory_space<vmem>>, vector<2x16xf32>,
    %c0_37 = arith.constant 0 : index
    %c0_38 = arith.constant 0 : index
    %c9 = arith.constant 9 : index
    %c0_39 = arith.constant 0 : index
    %27 = vector.load %arg1[%c0_37, %c0_38, %c9, %c0_39] : memref<2x4x16x16xf32, #tpu.memory_space<vmem>>, vector<2x1x1x16xf32>
    %28 = vector.shape_cast %27 : vector<2x1x1x16xf32> to vector<2x16xf32>
    %c0_40 = arith.constant 0 : index
    %c144 = arith.constant 144 : index
    %29 = vector.load %arg2[%c0_40, %c144] : memref<2x1024xf32, #tpu.memory_space<vmem>>, vector<2x16xf32>
    tpu.vector_store %arg2[%c0_40, %c144], %28 {strides = array<i32>} : memref<2x1024xf32, #tpu.memory_space<vmem>>, vector<2x16xf32>,
    %c0_41 = arith.constant 0 : index
    %c0_42 = arith.constant 0 : index
    %c10 = arith.constant 10 : index
    %c0_43 = arith.constant 0 : index
    %30 = vector.load %arg1[%c0_41, %c0_42, %c10, %c0_43] : memref<2x4x16x16xf32, #tpu.memory_space<vmem>>, vector<2x1x1x16xf32>
    %31 = vector.shape_cast %30 : vector<2x1x1x16xf32> to vector<2x16xf32>
    %c0_44 = arith.constant 0 : index
    %c160 = arith.constant 160 : index
    %32 = vector.load %arg2[%c0_44, %c160] : memref<2x1024xf32, #tpu.memory_space<vmem>>, vector<2x16xf32>
    tpu.vector_store %arg2[%c0_44, %c160], %31 {strides = array<i32>} : memref<2x1024xf32, #tpu.memory_space<vmem>>, vector<2x16xf32>,
    %c0_45 = arith.constant 0 : index
    %c0_46 = arith.constant 0 : index
    %c11 = arith.constant 11 : index
    %c0_47 = arith.constant 0 : index
    %33 = vector.load %arg1[%c0_45, %c0_46, %c11, %c0_47] : memref<2x4x16x16xf32, #tpu.memory_space<vmem>>, vector<2x1x1x16xf32>
    %34 = vector.shape_cast %33 : vector<2x1x1x16xf32> to vector<2x16xf32>
    %c0_48 = arith.constant 0 : index
    %c176 = arith.constant 176 : index
    %35 = vector.load %arg2[%c0_48, %c176] : memref<2x1024xf32, #tpu.memory_space<vmem>>, vector<2x16xf32>
    tpu.vector_store %arg2[%c0_48, %c176], %34 {strides = array<i32>} : memref<2x1024xf32, #tpu.memory_space<vmem>>, vector<2x16xf32>,
    %c0_49 = arith.constant 0 : index
    %c0_50 = arith.constant 0 : index
    %c12 = arith.constant 12 : index
    %c0_51 = arith.constant 0 : index
    %36 = vector.load %arg1[%c0_49, %c0_50, %c12, %c0_51] : memref<2x4x16x16xf32, #tpu.memory_space<vmem>>, vector<2x1x1x16xf32>
    %37 = vector.shape_cast %36 : vector<2x1x1x16xf32> to vector<2x16xf32>
    %c0_52 = arith.constant 0 : index
    %c192 = arith.constant 192 : index
    %38 = vector.load %arg2[%c0_52, %c192] : memref<2x1024xf32, #tpu.memory_space<vmem>>, vector<2x16xf32>
    tpu.vector_store %arg2[%c0_52, %c192], %37 {strides = array<i32>} : memref<2x1024xf32, #tpu.memory_space<vmem>>, vector<2x16xf32>,
    %c0_53 = arith.constant 0 : index
    %c0_54 = arith.constant 0 : index
    %c13 = arith.constant 13 : index
    %c0_55 = arith.constant 0 : index
    %39 = vector.load %arg1[%c0_53, %c0_54, %c13, %c0_55] : memref<2x4x16x16xf32, #tpu.memory_space<vmem>>, vector<2x1x1x16xf32>
    %40 = vector.shape_cast %39 : vector<2x1x1x16xf32> to vector<2x16xf32>
    %c0_56 = arith.constant 0 : index
    %c208 = arith.constant 208 : index
    %41 = vector.load %arg2[%c0_56, %c208] : memref<2x1024xf32, #tpu.memory_space<vmem>>, vector<2x16xf32>
    tpu.vector_store %arg2[%c0_56, %c208], %40 {strides = array<i32>} : memref<2x1024xf32, #tpu.memory_space<vmem>>, vector<2x16xf32>,
    %c0_57 = arith.constant 0 : index
    %c0_58 = arith.constant 0 : index
    %c14 = arith.constant 14 : index
    %c0_59 = arith.constant 0 : index
    %42 = vector.load %arg1[%c0_57, %c0_58, %c14, %c0_59] : memref<2x4x16x16xf32, #tpu.memory_space<vmem>>, vector<2x1x1x16xf32>
    %43 = vector.shape_cast %42 : vector<2x1x1x16xf32> to vector<2x16xf32>
    %c0_60 = arith.constant 0 : index
    %c224 = arith.constant 224 : index
    %44 = vector.load %arg2[%c0_60, %c224] : memref<2x1024xf32, #tpu.memory_space<vmem>>, vector<2x16xf32>
    tpu.vector_store %arg2[%c0_60, %c224], %43 {strides = array<i32>} : memref<2x1024xf32, #tpu.memory_space<vmem>>, vector<2x16xf32>,
    %c0_61 = arith.constant 0 : index
    %c0_62 = arith.constant 0 : index
    %c15 = arith.constant 15 : index
    %c0_63 = arith.constant 0 : index
    %45 = vector.load %arg1[%c0_61, %c0_62, %c15, %c0_63] : memref<2x4x16x16xf32, #tpu.memory_space<vmem>>, vector<2x1x1x16xf32>
    %46 = vector.shape_cast %45 : vector<2x1x1x16xf32> to vector<2x16xf32>
    %c0_64 = arith.constant 0 : index
    %c240 = arith.constant 240 : index
    %47 = vector.load %arg2[%c0_64, %c240] : memref<2x1024xf32, #tpu.memory_space<vmem>>, vector<2x16xf32>
    tpu.vector_store %arg2[%c0_64, %c240], %46 {strides = array<i32>} : memref<2x1024xf32, #tpu.memory_space<vmem>>, vector<2x16xf32>,
    %c0_65 = arith.constant 0 : index
    %c1_66 = arith.constant 1 : index
    %c0_67 = arith.constant 0 : index
    %c0_68 = arith.constant 0 : index
    %48 = vector.load %arg1[%c0_65, %c1_66, %c0_67, %c0_68] : memref<2x4x16x16xf32, #tpu.memory_space<vmem>>, vector<2x1x1x16xf32>
    %49 = vector.shape_cast %48 : vector<2x1x1x16xf32> to vector<2x16xf32>
    %c0_69 = arith.constant 0 : index
    %c256 = arith.constant 256 : index
    %50 = vector.load %arg2[%c0_69, %c256] : memref<2x1024xf32, #tpu.memory_space<vmem>>, vector<2x16xf32>
    tpu.vector_store %arg2[%c0_69, %c256], %49 {strides = array<i32>} : memref<2x1024xf32, #tpu.memory_space<vmem>>, vector<2x16xf32>,
    %c0_70 = arith.constant 0 : index
    %c1_71 = arith.constant 1 : index
    %c1_72 = arith.constant 1 : index
    %c0_73 = arith.constant 0 : index
    %51 = vector.load %arg1[%c0_70, %c1_71, %c1_72, %c0_73] : memref<2x4x16x16xf32, #tpu.memory_space<vmem>>, vector<2x1x1x16xf32>
    %52 = vector.shape_cast %51 : vector<2x1x1x16xf32> to vector<2x16xf32>
    %c0_74 = arith.constant 0 : index
    %c272 = arith.constant 272 : index
    %53 = vector.load %arg2[%c0_74, %c272] : memref<2x1024xf32, #tpu.memory_space<vmem>>, vector<2x16xf32>
    tpu.vector_store %arg2[%c0_74, %c272], %52 {strides = array<i32>} : memref<2x1024xf32, #tpu.memory_space<vmem>>, vector<2x16xf32>,
    %c0_75 = arith.constant 0 : index
    %c1_76 = arith.constant 1 : index
    %c2_77 = arith.constant 2 : index
    %c0_78 = arith.constant 0 : index
    %54 = vector.load %arg1[%c0_75, %c1_76, %c2_77, %c0_78] : memref<2x4x16x16xf32, #tpu.memory_space<vmem>>, vector<2x1x1x16xf32>
    %55 = vector.shape_cast %54 : vector<2x1x1x16xf32> to vector<2x16xf32>
    %c0_79 = arith.constant 0 : index
    %c288 = arith.constant 288 : index
    %56 = vector.load %arg2[%c0_79, %c288] : memref<2x1024xf32, #tpu.memory_space<vmem>>, vector<2x16xf32>
    tpu.vector_store %arg2[%c0_79, %c288], %55 {strides = array<i32>} : memref<2x1024xf32, #tpu.memory_space<vmem>>, vector<2x16xf32>,
    %c0_80 = arith.constant 0 : index
    %c1_81 = arith.constant 1 : index
    %c3_82 = arith.constant 3 : index
    %c0_83 = arith.constant 0 : index
    %57 = vector.load %arg1[%c0_80, %c1_81, %c3_82, %c0_83] : memref<2x4x16x16xf32, #tpu.memory_space<vmem>>, vector<2x1x1x16xf32>
    %58 = vector.shape_cast %57 : vector<2x1x1x16xf32> to vector<2x16xf32>
    %c0_84 = arith.constant 0 : index
    %c304 = arith.constant 304 : index
    %59 = vector.load %arg2[%c0_84, %c304] : memref<2x1024xf32, #tpu.memory_space<vmem>>, vector<2x16xf32>
    tpu.vector_store %arg2[%c0_84, %c304], %58 {strides = array<i32>} : memref<2x1024xf32, #tpu.memory_space<vmem>>, vector<2x16xf32>,
    %c0_85 = arith.constant 0 : index
    %c1_86 = arith.constant 1 : index
    %c4_87 = arith.constant 4 : index
    %c0_88 = arith.constant 0 : index
    %60 = vector.load %arg1[%c0_85, %c1_86, %c4_87, %c0_88] : memref<2x4x16x16xf32, #tpu.memory_space<vmem>>, vector<2x1x1x16xf32>
    %61 = vector.shape_cast %60 : vector<2x1x1x16xf32> to vector<2x16xf32>
    %c0_89 = arith.constant 0 : index
    %c320 = arith.constant 320 : index
    %62 = vector.load %arg2[%c0_89, %c320] : memref<2x1024xf32, #tpu.memory_space<vmem>>, vector<2x16xf32>
    tpu.vector_store %arg2[%c0_89, %c320], %61 {strides = array<i32>} : memref<2x1024xf32, #tpu.memory_space<vmem>>, vector<2x16xf32>,
    %c0_90 = arith.constant 0 : index
    %c1_91 = arith.constant 1 : index
    %c5_92 = arith.constant 5 : index
    %c0_93 = arith.constant 0 : index
    %63 = vector.load %arg1[%c0_90, %c1_91, %c5_92, %c0_93] : memref<2x4x16x16xf32, #tpu.memory_space<vmem>>, vector<2x1x1x16xf32>
    %64 = vector.shape_cast %63 : vector<2x1x1x16xf32> to vector<2x16xf32>
    %c0_94 = arith.constant 0 : index
    %c336 = arith.constant 336 : index
    %65 = vector.load %arg2[%c0_94, %c336] : memref<2x1024xf32, #tpu.memory_space<vmem>>, vector<2x16xf32>
    tpu.vector_store %arg2[%c0_94, %c336], %64 {strides = array<i32>} : memref<2x1024xf32, #tpu.memory_space<vmem>>, vector<2x16xf32>,
    %c0_95 = arith.constant 0 : index
    %c1_96 = arith.constant 1 : index
    %c6_97 = arith.constant 6 : index
    %c0_98 = arith.constant 0 : index
    %66 = vector.load %arg1[%c0_95, %c1_96, %c6_97, %c0_98] : memref<2x4x16x16xf32, #tpu.memory_space<vmem>>, vector<2x1x1x16xf32>
    %67 = vector.shape_cast %66 : vector<2x1x1x16xf32> to vector<2x16xf32>
    %c0_99 = arith.constant 0 : index
    %c352 = arith.constant 352 : index
    %68 = vector.load %arg2[%c0_99, %c352] : memref<2x1024xf32, #tpu.memory_space<vmem>>, vector<2x16xf32>
    tpu.vector_store %arg2[%c0_99, %c352], %67 {strides = array<i32>} : memref<2x1024xf32, #tpu.memory_space<vmem>>, vector<2x16xf32>,
    %c0_100 = arith.constant 0 : index
    %c1_101 = arith.constant 1 : index
    %c7_102 = arith.constant 7 : index
    %c0_103 = arith.constant 0 : index
    %69 = vector.load %arg1[%c0_100, %c1_101, %c7_102, %c0_103] : memref<2x4x16x16xf32, #tpu.memory_space<vmem>>, vector<2x1x1x16xf32>
    %70 = vector.shape_cast %69 : vector<2x1x1x16xf32> to vector<2x16xf32>
    %c0_104 = arith.constant 0 : index
    %c368 = arith.constant 368 : index
    %71 = vector.load %arg2[%c0_104, %c368] : memref<2x1024xf32, #tpu.memory_space<vmem>>, vector<2x16xf32>
    tpu.vector_store %arg2[%c0_104, %c368], %70 {strides = array<i32>} : memref<2x1024xf32, #tpu.memory_space<vmem>>, vector<2x16xf32>,
    %c0_105 = arith.constant 0 : index
    %c1_106 = arith.constant 1 : index
    %c8_107 = arith.constant 8 : index
    %c0_108 = arith.constant 0 : index
    %72 = vector.load %arg1[%c0_105, %c1_106, %c8_107, %c0_108] : memref<2x4x16x16xf32, #tpu.memory_space<vmem>>, vector<2x1x1x16xf32>
    %73 = vector.shape_cast %72 : vector<2x1x1x16xf32> to vector<2x16xf32>
    %c0_109 = arith.constant 0 : index
    %c384 = arith.constant 384 : index
    %74 = vector.load %arg2[%c0_109, %c384] : memref<2x1024xf32, #tpu.memory_space<vmem>>, vector<2x16xf32>
    tpu.vector_store %arg2[%c0_109, %c384], %73 {strides = array<i32>} : memref<2x1024xf32, #tpu.memory_space<vmem>>, vector<2x16xf32>,
    %c0_110 = arith.constant 0 : index
    %c1_111 = arith.constant 1 : index
    %c9_112 = arith.constant 9 : index
    %c0_113 = arith.constant 0 : index
    %75 = vector.load %arg1[%c0_110, %c1_111, %c9_112, %c0_113] : memref<2x4x16x16xf32, #tpu.memory_space<vmem>>, vector<2x1x1x16xf32>
    %76 = vector.shape_cast %75 : vector<2x1x1x16xf32> to vector<2x16xf32>
    %c0_114 = arith.constant 0 : index
    %c400 = arith.constant 400 : index
    %77 = vector.load %arg2[%c0_114, %c400] : memref<2x1024xf32, #tpu.memory_space<vmem>>, vector<2x16xf32>
    tpu.vector_store %arg2[%c0_114, %c400], %76 {strides = array<i32>} : memref<2x1024xf32, #tpu.memory_space<vmem>>, vector<2x16xf32>,
    %c0_115 = arith.constant 0 : index
    %c1_116 = arith.constant 1 : index
    %c10_117 = arith.constant 10 : index
    %c0_118 = arith.constant 0 : index
    %78 = vector.load %arg1[%c0_115, %c1_116, %c10_117, %c0_118] : memref<2x4x16x16xf32, #tpu.memory_space<vmem>>, vector<2x1x1x16xf32>
    %79 = vector.shape_cast %78 : vector<2x1x1x16xf32> to vector<2x16xf32>
    %c0_119 = arith.constant 0 : index
    %c416 = arith.constant 416 : index
    %80 = vector.load %arg2[%c0_119, %c416] : memref<2x1024xf32, #tpu.memory_space<vmem>>, vector<2x16xf32>
    tpu.vector_store %arg2[%c0_119, %c416], %79 {strides = array<i32>} : memref<2x1024xf32, #tpu.memory_space<vmem>>, vector<2x16xf32>,
    %c0_120 = arith.constant 0 : index
    %c1_121 = arith.constant 1 : index
    %c11_122 = arith.constant 11 : index
    %c0_123 = arith.constant 0 : index
    %81 = vector.load %arg1[%c0_120, %c1_121, %c11_122, %c0_123] : memref<2x4x16x16xf32, #tpu.memory_space<vmem>>, vector<2x1x1x16xf32>
    %82 = vector.shape_cast %81 : vector<2x1x1x16xf32> to vector<2x16xf32>
    %c0_124 = arith.constant 0 : index
    %c432 = arith.constant 432 : index
    %83 = vector.load %arg2[%c0_124, %c432] : memref<2x1024xf32, #tpu.memory_space<vmem>>, vector<2x16xf32>
    tpu.vector_store %arg2[%c0_124, %c432], %82 {strides = array<i32>} : memref<2x1024xf32, #tpu.memory_space<vmem>>, vector<2x16xf32>,
    %c0_125 = arith.constant 0 : index
    %c1_126 = arith.constant 1 : index
    %c12_127 = arith.constant 12 : index
    %c0_128 = arith.constant 0 : index
    %84 = vector.load %arg1[%c0_125, %c1_126, %c12_127, %c0_128] : memref<2x4x16x16xf32, #tpu.memory_space<vmem>>, vector<2x1x1x16xf32>
    %85 = vector.shape_cast %84 : vector<2x1x1x16xf32> to vector<2x16xf32>
    %c0_129 = arith.constant 0 : index
    %c448 = arith.constant 448 : index
    %86 = vector.load %arg2[%c0_129, %c448] : memref<2x1024xf32, #tpu.memory_space<vmem>>, vector<2x16xf32>
    tpu.vector_store %arg2[%c0_129, %c448], %85 {strides = array<i32>} : memref<2x1024xf32, #tpu.memory_space<vmem>>, vector<2x16xf32>,
    %c0_130 = arith.constant 0 : index
    %c1_131 = arith.constant 1 : index
    %c13_132 = arith.constant 13 : index
    %c0_133 = arith.constant 0 : index
    %87 = vector.load %arg1[%c0_130, %c1_131, %c13_132, %c0_133] : memref<2x4x16x16xf32, #tpu.memory_space<vmem>>, vector<2x1x1x16xf32>
    %88 = vector.shape_cast %87 : vector<2x1x1x16xf32> to vector<2x16xf32>
    %c0_134 = arith.constant 0 : index
    %c464 = arith.constant 464 : index
    %89 = vector.load %arg2[%c0_134, %c464] : memref<2x1024xf32, #tpu.memory_space<vmem>>, vector<2x16xf32>
    tpu.vector_store %arg2[%c0_134, %c464], %88 {strides = array<i32>} : memref<2x1024xf32, #tpu.memory_space<vmem>>, vector<2x16xf32>,
    %c0_135 = arith.constant 0 : index
    %c1_136 = arith.constant 1 : index
    %c14_137 = arith.constant 14 : index
    %c0_138 = arith.constant 0 : index
    %90 = vector.load %arg1[%c0_135, %c1_136, %c14_137, %c0_138] : memref<2x4x16x16xf32, #tpu.memory_space<vmem>>, vector<2x1x1x16xf32>
    %91 = vector.shape_cast %90 : vector<2x1x1x16xf32> to vector<2x16xf32>
    %c0_139 = arith.constant 0 : index
    %c480 = arith.constant 480 : index
    %92 = vector.load %arg2[%c0_139, %c480] : memref<2x1024xf32, #tpu.memory_space<vmem>>, vector<2x16xf32>
    tpu.vector_store %arg2[%c0_139, %c480], %91 {strides = array<i32>} : memref<2x1024xf32, #tpu.memory_space<vmem>>, vector<2x16xf32>,
    %c0_140 = arith.constant 0 : index
    %c1_141 = arith.constant 1 : index
    %c15_142 = arith.constant 15 : index
    %c0_143 = arith.constant 0 : index
    %93 = vector.load %arg1[%c0_140, %c1_141, %c15_142, %c0_143] : memref<2x4x16x16xf32, #tpu.memory_space<vmem>>, vector<2x1x1x16xf32>
    %94 = vector.shape_cast %93 : vector<2x1x1x16xf32> to vector<2x16xf32>
    %c0_144 = arith.constant 0 : index
    %c496 = arith.constant 496 : index
    %95 = vector.load %arg2[%c0_144, %c496] : memref<2x1024xf32, #tpu.memory_space<vmem>>, vector<2x16xf32>
    tpu.vector_store %arg2[%c0_144, %c496], %94 {strides = array<i32>} : memref<2x1024xf32, #tpu.memory_space<vmem>>, vector<2x16xf32>,
    %c0_145 = arith.constant 0 : index
    %c2_146 = arith.constant 2 : index
    %c0_147 = arith.constant 0 : index
    %c0_148 = arith.constant 0 : index
    %96 = vector.load %arg1[%c0_145, %c2_146, %c0_147, %c0_148] : memref<2x4x16x16xf32, #tpu.memory_space<vmem>>, vector<2x1x1x16xf32>
    %97 = vector.shape_cast %96 : vector<2x1x1x16xf32> to vector<2x16xf32>
    %c0_149 = arith.constant 0 : index
    %c512 = arith.constant 512 : index
    %98 = vector.load %arg2[%c0_149, %c512] : memref<2x1024xf32, #tpu.memory_space<vmem>>, vector<2x16xf32>
    tpu.vector_store %arg2[%c0_149, %c512], %97 {strides = array<i32>} : memref<2x1024xf32, #tpu.memory_space<vmem>>, vector<2x16xf32>,
    %c0_150 = arith.constant 0 : index
    %c2_151 = arith.constant 2 : index
    %c1_152 = arith.constant 1 : index
    %c0_153 = arith.constant 0 : index
    %99 = vector.load %arg1[%c0_150, %c2_151, %c1_152, %c0_153] : memref<2x4x16x16xf32, #tpu.memory_space<vmem>>, vector<2x1x1x16xf32>
    %100 = vector.shape_cast %99 : vector<2x1x1x16xf32> to vector<2x16xf32>
    %c0_154 = arith.constant 0 : index
    %c528 = arith.constant 528 : index
    %101 = vector.load %arg2[%c0_154, %c528] : memref<2x1024xf32, #tpu.memory_space<vmem>>, vector<2x16xf32>
    tpu.vector_store %arg2[%c0_154, %c528], %100 {strides = array<i32>} : memref<2x1024xf32, #tpu.memory_space<vmem>>, vector<2x16xf32>,
    %c0_155 = arith.constant 0 : index
    %c2_156 = arith.constant 2 : index
    %c2_157 = arith.constant 2 : index
    %c0_158 = arith.constant 0 : index
    %102 = vector.load %arg1[%c0_155, %c2_156, %c2_157, %c0_158] : memref<2x4x16x16xf32, #tpu.memory_space<vmem>>, vector<2x1x1x16xf32>
    %103 = vector.shape_cast %102 : vector<2x1x1x16xf32> to vector<2x16xf32>
    %c0_159 = arith.constant 0 : index
    %c544 = arith.constant 544 : index
    %104 = vector.load %arg2[%c0_159, %c544] : memref<2x1024xf32, #tpu.memory_space<vmem>>, vector<2x16xf32>
    tpu.vector_store %arg2[%c0_159, %c544], %103 {strides = array<i32>} : memref<2x1024xf32, #tpu.memory_space<vmem>>, vector<2x16xf32>,
    %c0_160 = arith.constant 0 : index
    %c2_161 = arith.constant 2 : index
    %c3_162 = arith.constant 3 : index
    %c0_163 = arith.constant 0 : index
    %105 = vector.load %arg1[%c0_160, %c2_161, %c3_162, %c0_163] : memref<2x4x16x16xf32, #tpu.memory_space<vmem>>, vector<2x1x1x16xf32>
    %106 = vector.shape_cast %105 : vector<2x1x1x16xf32> to vector<2x16xf32>
    %c0_164 = arith.constant 0 : index
    %c560 = arith.constant 560 : index
    %107 = vector.load %arg2[%c0_164, %c560] : memref<2x1024xf32, #tpu.memory_space<vmem>>, vector<2x16xf32>
    tpu.vector_store %arg2[%c0_164, %c560], %106 {strides = array<i32>} : memref<2x1024xf32, #tpu.memory_space<vmem>>, vector<2x16xf32>,
    %c0_165 = arith.constant 0 : index
    %c2_166 = arith.constant 2 : index
    %c4_167 = arith.constant 4 : index
    %c0_168 = arith.constant 0 : index
    %108 = vector.load %arg1[%c0_165, %c2_166, %c4_167, %c0_168] : memref<2x4x16x16xf32, #tpu.memory_space<vmem>>, vector<2x1x1x16xf32>
    %109 = vector.shape_cast %108 : vector<2x1x1x16xf32> to vector<2x16xf32>
    %c0_169 = arith.constant 0 : index
    %c576 = arith.constant 576 : index
    %110 = vector.load %arg2[%c0_169, %c576] : memref<2x1024xf32, #tpu.memory_space<vmem>>, vector<2x16xf32>
    tpu.vector_store %arg2[%c0_169, %c576], %109 {strides = array<i32>} : memref<2x1024xf32, #tpu.memory_space<vmem>>, vector<2x16xf32>,
    %c0_170 = arith.constant 0 : index
    %c2_171 = arith.constant 2 : index
    %c5_172 = arith.constant 5 : index
    %c0_173 = arith.constant 0 : index
    %111 = vector.load %arg1[%c0_170, %c2_171, %c5_172, %c0_173] : memref<2x4x16x16xf32, #tpu.memory_space<vmem>>, vector<2x1x1x16xf32>
    %112 = vector.shape_cast %111 : vector<2x1x1x16xf32> to vector<2x16xf32>
    %c0_174 = arith.constant 0 : index
    %c592 = arith.constant 592 : index
    %113 = vector.load %arg2[%c0_174, %c592] : memref<2x1024xf32, #tpu.memory_space<vmem>>, vector<2x16xf32>
    tpu.vector_store %arg2[%c0_174, %c592], %112 {strides = array<i32>} : memref<2x1024xf32, #tpu.memory_space<vmem>>, vector<2x16xf32>,
    %c0_175 = arith.constant 0 : index
    %c2_176 = arith.constant 2 : index
    %c6_177 = arith.constant 6 : index
    %c0_178 = arith.constant 0 : index
    %114 = vector.load %arg1[%c0_175, %c2_176, %c6_177, %c0_178] : memref<2x4x16x16xf32, #tpu.memory_space<vmem>>, vector<2x1x1x16xf32>
    %115 = vector.shape_cast %114 : vector<2x1x1x16xf32> to vector<2x16xf32>
    %c0_179 = arith.constant 0 : index
    %c608 = arith.constant 608 : index
    %116 = vector.load %arg2[%c0_179, %c608] : memref<2x1024xf32, #tpu.memory_space<vmem>>, vector<2x16xf32>
    tpu.vector_store %arg2[%c0_179, %c608], %115 {strides = array<i32>} : memref<2x1024xf32, #tpu.memory_space<vmem>>, vector<2x16xf32>,
    %c0_180 = arith.constant 0 : index
    %c2_181 = arith.constant 2 : index
    %c7_182 = arith.constant 7 : index
    %c0_183 = arith.constant 0 : index
    %117 = vector.load %arg1[%c0_180, %c2_181, %c7_182, %c0_183] : memref<2x4x16x16xf32, #tpu.memory_space<vmem>>, vector<2x1x1x16xf32>
    %118 = vector.shape_cast %117 : vector<2x1x1x16xf32> to vector<2x16xf32>
    %c0_184 = arith.constant 0 : index
    %c624 = arith.constant 624 : index
    %119 = vector.load %arg2[%c0_184, %c624] : memref<2x1024xf32, #tpu.memory_space<vmem>>, vector<2x16xf32>
    tpu.vector_store %arg2[%c0_184, %c624], %118 {strides = array<i32>} : memref<2x1024xf32, #tpu.memory_space<vmem>>, vector<2x16xf32>,
    %c0_185 = arith.constant 0 : index
    %c2_186 = arith.constant 2 : index
    %c8_187 = arith.constant 8 : index
    %c0_188 = arith.constant 0 : index
    %120 = vector.load %arg1[%c0_185, %c2_186, %c8_187, %c0_188] : memref<2x4x16x16xf32, #tpu.memory_space<vmem>>, vector<2x1x1x16xf32>
    %121 = vector.shape_cast %120 : vector<2x1x1x16xf32> to vector<2x16xf32>
    %c0_189 = arith.constant 0 : index
    %c640 = arith.constant 640 : index
    %122 = vector.load %arg2[%c0_189, %c640] : memref<2x1024xf32, #tpu.memory_space<vmem>>, vector<2x16xf32>
    tpu.vector_store %arg2[%c0_189, %c640], %121 {strides = array<i32>} : memref<2x1024xf32, #tpu.memory_space<vmem>>, vector<2x16xf32>,
    %c0_190 = arith.constant 0 : index
    %c2_191 = arith.constant 2 : index
    %c9_192 = arith.constant 9 : index
    %c0_193 = arith.constant 0 : index
    %123 = vector.load %arg1[%c0_190, %c2_191, %c9_192, %c0_193] : memref<2x4x16x16xf32, #tpu.memory_space<vmem>>, vector<2x1x1x16xf32>
    %124 = vector.shape_cast %123 : vector<2x1x1x16xf32> to vector<2x16xf32>
    %c0_194 = arith.constant 0 : index
    %c656 = arith.constant 656 : index
    %125 = vector.load %arg2[%c0_194, %c656] : memref<2x1024xf32, #tpu.memory_space<vmem>>, vector<2x16xf32>
    tpu.vector_store %arg2[%c0_194, %c656], %124 {strides = array<i32>} : memref<2x1024xf32, #tpu.memory_space<vmem>>, vector<2x16xf32>,
    %c0_195 = arith.constant 0 : index
    %c2_196 = arith.constant 2 : index
    %c10_197 = arith.constant 10 : index
    %c0_198 = arith.constant 0 : index
    %126 = vector.load %arg1[%c0_195, %c2_196, %c10_197, %c0_198] : memref<2x4x16x16xf32, #tpu.memory_space<vmem>>, vector<2x1x1x16xf32>
    %127 = vector.shape_cast %126 : vector<2x1x1x16xf32> to vector<2x16xf32>
    %c0_199 = arith.constant 0 : index
    %c672 = arith.constant 672 : index
    %128 = vector.load %arg2[%c0_199, %c672] : memref<2x1024xf32, #tpu.memory_space<vmem>>, vector<2x16xf32>
    tpu.vector_store %arg2[%c0_199, %c672], %127 {strides = array<i32>} : memref<2x1024xf32, #tpu.memory_space<vmem>>, vector<2x16xf32>,
    %c0_200 = arith.constant 0 : index
    %c2_201 = arith.constant 2 : index
    %c11_202 = arith.constant 11 : index
    %c0_203 = arith.constant 0 : index
    %129 = vector.load %arg1[%c0_200, %c2_201, %c11_202, %c0_203] : memref<2x4x16x16xf32, #tpu.memory_space<vmem>>, vector<2x1x1x16xf32>
    %130 = vector.shape_cast %129 : vector<2x1x1x16xf32> to vector<2x16xf32>
    %c0_204 = arith.constant 0 : index
    %c688 = arith.constant 688 : index
    %131 = vector.load %arg2[%c0_204, %c688] : memref<2x1024xf32, #tpu.memory_space<vmem>>, vector<2x16xf32>
    tpu.vector_store %arg2[%c0_204, %c688], %130 {strides = array<i32>} : memref<2x1024xf32, #tpu.memory_space<vmem>>, vector<2x16xf32>,
    %c0_205 = arith.constant 0 : index
    %c2_206 = arith.constant 2 : index
    %c12_207 = arith.constant 12 : index
    %c0_208 = arith.constant 0 : index
    %132 = vector.load %arg1[%c0_205, %c2_206, %c12_207, %c0_208] : memref<2x4x16x16xf32, #tpu.memory_space<vmem>>, vector<2x1x1x16xf32>
    %133 = vector.shape_cast %132 : vector<2x1x1x16xf32> to vector<2x16xf32>
    %c0_209 = arith.constant 0 : index
    %c704 = arith.constant 704 : index
    %134 = vector.load %arg2[%c0_209, %c704] : memref<2x1024xf32, #tpu.memory_space<vmem>>, vector<2x16xf32>
    tpu.vector_store %arg2[%c0_209, %c704], %133 {strides = array<i32>} : memref<2x1024xf32, #tpu.memory_space<vmem>>, vector<2x16xf32>,
    %c0_210 = arith.constant 0 : index
    %c2_211 = arith.constant 2 : index
    %c13_212 = arith.constant 13 : index
    %c0_213 = arith.constant 0 : index
    %135 = vector.load %arg1[%c0_210, %c2_211, %c13_212, %c0_213] : memref<2x4x16x16xf32, #tpu.memory_space<vmem>>, vector<2x1x1x16xf32>
    %136 = vector.shape_cast %135 : vector<2x1x1x16xf32> to vector<2x16xf32>
    %c0_214 = arith.constant 0 : index
    %c720 = arith.constant 720 : index
    %137 = vector.load %arg2[%c0_214, %c720] : memref<2x1024xf32, #tpu.memory_space<vmem>>, vector<2x16xf32>
    tpu.vector_store %arg2[%c0_214, %c720], %136 {strides = array<i32>} : memref<2x1024xf32, #tpu.memory_space<vmem>>, vector<2x16xf32>,
    %c0_215 = arith.constant 0 : index
    %c2_216 = arith.constant 2 : index
    %c14_217 = arith.constant 14 : index
    %c0_218 = arith.constant 0 : index
    %138 = vector.load %arg1[%c0_215, %c2_216, %c14_217, %c0_218] : memref<2x4x16x16xf32, #tpu.memory_space<vmem>>, vector<2x1x1x16xf32>
    %139 = vector.shape_cast %138 : vector<2x1x1x16xf32> to vector<2x16xf32>
    %c0_219 = arith.constant 0 : index
    %c736 = arith.constant 736 : index
    %140 = vector.load %arg2[%c0_219, %c736] : memref<2x1024xf32, #tpu.memory_space<vmem>>, vector<2x16xf32>
    tpu.vector_store %arg2[%c0_219, %c736], %139 {strides = array<i32>} : memref<2x1024xf32, #tpu.memory_space<vmem>>, vector<2x16xf32>,
    %c0_220 = arith.constant 0 : index
    %c2_221 = arith.constant 2 : index
    %c15_222 = arith.constant 15 : index
    %c0_223 = arith.constant 0 : index
    %141 = vector.load %arg1[%c0_220, %c2_221, %c15_222, %c0_223] : memref<2x4x16x16xf32, #tpu.memory_space<vmem>>, vector<2x1x1x16xf32>
    %142 = vector.shape_cast %141 : vector<2x1x1x16xf32> to vector<2x16xf32>
    %c0_224 = arith.constant 0 : index
    %c752 = arith.constant 752 : index
    %143 = vector.load %arg2[%c0_224, %c752] : memref<2x1024xf32, #tpu.memory_space<vmem>>, vector<2x16xf32>
    tpu.vector_store %arg2[%c0_224, %c752], %142 {strides = array<i32>} : memref<2x1024xf32, #tpu.memory_space<vmem>>, vector<2x16xf32>,
    %c0_225 = arith.constant 0 : index
    %c3_226 = arith.constant 3 : index
    %c0_227 = arith.constant 0 : index
    %c0_228 = arith.constant 0 : index
    %144 = vector.load %arg1[%c0_225, %c3_226, %c0_227, %c0_228] : memref<2x4x16x16xf32, #tpu.memory_space<vmem>>, vector<2x1x1x16xf32>
    %145 = vector.shape_cast %144 : vector<2x1x1x16xf32> to vector<2x16xf32>
    %c0_229 = arith.constant 0 : index
    %c768 = arith.constant 768 : index
    %146 = vector.load %arg2[%c0_229, %c768] : memref<2x1024xf32, #tpu.memory_space<vmem>>, vector<2x16xf32>
    tpu.vector_store %arg2[%c0_229, %c768], %145 {strides = array<i32>} : memref<2x1024xf32, #tpu.memory_space<vmem>>, vector<2x16xf32>,
    %c0_230 = arith.constant 0 : index
    %c3_231 = arith.constant 3 : index
    %c1_232 = arith.constant 1 : index
    %c0_233 = arith.constant 0 : index
    %147 = vector.load %arg1[%c0_230, %c3_231, %c1_232, %c0_233] : memref<2x4x16x16xf32, #tpu.memory_space<vmem>>, vector<2x1x1x16xf32>
    %148 = vector.shape_cast %147 : vector<2x1x1x16xf32> to vector<2x16xf32>
    %c0_234 = arith.constant 0 : index
    %c784 = arith.constant 784 : index
    %149 = vector.load %arg2[%c0_234, %c784] : memref<2x1024xf32, #tpu.memory_space<vmem>>, vector<2x16xf32>
    tpu.vector_store %arg2[%c0_234, %c784], %148 {strides = array<i32>} : memref<2x1024xf32, #tpu.memory_space<vmem>>, vector<2x16xf32>,
    %c0_235 = arith.constant 0 : index
    %c3_236 = arith.constant 3 : index
    %c2_237 = arith.constant 2 : index
    %c0_238 = arith.constant 0 : index
    %150 = vector.load %arg1[%c0_235, %c3_236, %c2_237, %c0_238] : memref<2x4x16x16xf32, #tpu.memory_space<vmem>>, vector<2x1x1x16xf32>
    %151 = vector.shape_cast %150 : vector<2x1x1x16xf32> to vector<2x16xf32>
    %c0_239 = arith.constant 0 : index
    %c800 = arith.constant 800 : index
    %152 = vector.load %arg2[%c0_239, %c800] : memref<2x1024xf32, #tpu.memory_space<vmem>>, vector<2x16xf32>
    tpu.vector_store %arg2[%c0_239, %c800], %151 {strides = array<i32>} : memref<2x1024xf32, #tpu.memory_space<vmem>>, vector<2x16xf32>,
    %c0_240 = arith.constant 0 : index
    %c3_241 = arith.constant 3 : index
    %c3_242 = arith.constant 3 : index
    %c0_243 = arith.constant 0 : index
    %153 = vector.load %arg1[%c0_240, %c3_241, %c3_242, %c0_243] : memref<2x4x16x16xf32, #tpu.memory_space<vmem>>, vector<2x1x1x16xf32>
    %154 = vector.shape_cast %153 : vector<2x1x1x16xf32> to vector<2x16xf32>
    %c0_244 = arith.constant 0 : index
    %c816 = arith.constant 816 : index
    %155 = vector.load %arg2[%c0_244, %c816] : memref<2x1024xf32, #tpu.memory_space<vmem>>, vector<2x16xf32>
    tpu.vector_store %arg2[%c0_244, %c816], %154 {strides = array<i32>} : memref<2x1024xf32, #tpu.memory_space<vmem>>, vector<2x16xf32>,
    %c0_245 = arith.constant 0 : index
    %c3_246 = arith.constant 3 : index
    %c4_247 = arith.constant 4 : index
    %c0_248 = arith.constant 0 : index
    %156 = vector.load %arg1[%c0_245, %c3_246, %c4_247, %c0_248] : memref<2x4x16x16xf32, #tpu.memory_space<vmem>>, vector<2x1x1x16xf32>
    %157 = vector.shape_cast %156 : vector<2x1x1x16xf32> to vector<2x16xf32>
    %c0_249 = arith.constant 0 : index
    %c832 = arith.constant 832 : index
    %158 = vector.load %arg2[%c0_249, %c832] : memref<2x1024xf32, #tpu.memory_space<vmem>>, vector<2x16xf32>
    tpu.vector_store %arg2[%c0_249, %c832], %157 {strides = array<i32>} : memref<2x1024xf32, #tpu.memory_space<vmem>>, vector<2x16xf32>,
    %c0_250 = arith.constant 0 : index
    %c3_251 = arith.constant 3 : index
    %c5_252 = arith.constant 5 : index
    %c0_253 = arith.constant 0 : index
    %159 = vector.load %arg1[%c0_250, %c3_251, %c5_252, %c0_253] : memref<2x4x16x16xf32, #tpu.memory_space<vmem>>, vector<2x1x1x16xf32>
    %160 = vector.shape_cast %159 : vector<2x1x1x16xf32> to vector<2x16xf32>
    %c0_254 = arith.constant 0 : index
    %c848 = arith.constant 848 : index
    %161 = vector.load %arg2[%c0_254, %c848] : memref<2x1024xf32, #tpu.memory_space<vmem>>, vector<2x16xf32>
    tpu.vector_store %arg2[%c0_254, %c848], %160 {strides = array<i32>} : memref<2x1024xf32, #tpu.memory_space<vmem>>, vector<2x16xf32>,
    %c0_255 = arith.constant 0 : index
    %c3_256 = arith.constant 3 : index
    %c6_257 = arith.constant 6 : index
    %c0_258 = arith.constant 0 : index
    %162 = vector.load %arg1[%c0_255, %c3_256, %c6_257, %c0_258] : memref<2x4x16x16xf32, #tpu.memory_space<vmem>>, vector<2x1x1x16xf32>
    %163 = vector.shape_cast %162 : vector<2x1x1x16xf32> to vector<2x16xf32>
    %c0_259 = arith.constant 0 : index
    %c864 = arith.constant 864 : index
    %164 = vector.load %arg2[%c0_259, %c864] : memref<2x1024xf32, #tpu.memory_space<vmem>>, vector<2x16xf32>
    tpu.vector_store %arg2[%c0_259, %c864], %163 {strides = array<i32>} : memref<2x1024xf32, #tpu.memory_space<vmem>>, vector<2x16xf32>,
    %c0_260 = arith.constant 0 : index
    %c3_261 = arith.constant 3 : index
    %c7_262 = arith.constant 7 : index
    %c0_263 = arith.constant 0 : index
    %165 = vector.load %arg1[%c0_260, %c3_261, %c7_262, %c0_263] : memref<2x4x16x16xf32, #tpu.memory_space<vmem>>, vector<2x1x1x16xf32>
    %166 = vector.shape_cast %165 : vector<2x1x1x16xf32> to vector<2x16xf32>
    %c0_264 = arith.constant 0 : index
    %c880 = arith.constant 880 : index
    %167 = vector.load %arg2[%c0_264, %c880] : memref<2x1024xf32, #tpu.memory_space<vmem>>, vector<2x16xf32>
    tpu.vector_store %arg2[%c0_264, %c880], %166 {strides = array<i32>} : memref<2x1024xf32, #tpu.memory_space<vmem>>, vector<2x16xf32>,
    %c0_265 = arith.constant 0 : index
    %c3_266 = arith.constant 3 : index
    %c8_267 = arith.constant 8 : index
    %c0_268 = arith.constant 0 : index
    %168 = vector.load %arg1[%c0_265, %c3_266, %c8_267, %c0_268] : memref<2x4x16x16xf32, #tpu.memory_space<vmem>>, vector<2x1x1x16xf32>
    %169 = vector.shape_cast %168 : vector<2x1x1x16xf32> to vector<2x16xf32>
    %c0_269 = arith.constant 0 : index
    %c896 = arith.constant 896 : index
    %170 = vector.load %arg2[%c0_269, %c896] : memref<2x1024xf32, #tpu.memory_space<vmem>>, vector<2x16xf32>
    tpu.vector_store %arg2[%c0_269, %c896], %169 {strides = array<i32>} : memref<2x1024xf32, #tpu.memory_space<vmem>>, vector<2x16xf32>,
    %c0_270 = arith.constant 0 : index
    %c3_271 = arith.constant 3 : index
    %c9_272 = arith.constant 9 : index
    %c0_273 = arith.constant 0 : index
    %171 = vector.load %arg1[%c0_270, %c3_271, %c9_272, %c0_273] : memref<2x4x16x16xf32, #tpu.memory_space<vmem>>, vector<2x1x1x16xf32>
    %172 = vector.shape_cast %171 : vector<2x1x1x16xf32> to vector<2x16xf32>
    %c0_274 = arith.constant 0 : index
    %c912 = arith.constant 912 : index
    %173 = vector.load %arg2[%c0_274, %c912] : memref<2x1024xf32, #tpu.memory_space<vmem>>, vector<2x16xf32>
    tpu.vector_store %arg2[%c0_274, %c912], %172 {strides = array<i32>} : memref<2x1024xf32, #tpu.memory_space<vmem>>, vector<2x16xf32>,
    %c0_275 = arith.constant 0 : index
    %c3_276 = arith.constant 3 : index
    %c10_277 = arith.constant 10 : index
    %c0_278 = arith.constant 0 : index
    %174 = vector.load %arg1[%c0_275, %c3_276, %c10_277, %c0_278] : memref<2x4x16x16xf32, #tpu.memory_space<vmem>>, vector<2x1x1x16xf32>
    %175 = vector.shape_cast %174 : vector<2x1x1x16xf32> to vector<2x16xf32>
    %c0_279 = arith.constant 0 : index
    %c928 = arith.constant 928 : index
    %176 = vector.load %arg2[%c0_279, %c928] : memref<2x1024xf32, #tpu.memory_space<vmem>>, vector<2x16xf32>
    tpu.vector_store %arg2[%c0_279, %c928], %175 {strides = array<i32>} : memref<2x1024xf32, #tpu.memory_space<vmem>>, vector<2x16xf32>,
    %c0_280 = arith.constant 0 : index
    %c3_281 = arith.constant 3 : index
    %c11_282 = arith.constant 11 : index
    %c0_283 = arith.constant 0 : index
    %177 = vector.load %arg1[%c0_280, %c3_281, %c11_282, %c0_283] : memref<2x4x16x16xf32, #tpu.memory_space<vmem>>, vector<2x1x1x16xf32>
    %178 = vector.shape_cast %177 : vector<2x1x1x16xf32> to vector<2x16xf32>
    %c0_284 = arith.constant 0 : index
    %c944 = arith.constant 944 : index
    %179 = vector.load %arg2[%c0_284, %c944] : memref<2x1024xf32, #tpu.memory_space<vmem>>, vector<2x16xf32>
    tpu.vector_store %arg2[%c0_284, %c944], %178 {strides = array<i32>} : memref<2x1024xf32, #tpu.memory_space<vmem>>, vector<2x16xf32>,
    %c0_285 = arith.constant 0 : index
    %c3_286 = arith.constant 3 : index
    %c12_287 = arith.constant 12 : index
    %c0_288 = arith.constant 0 : index
    %180 = vector.load %arg1[%c0_285, %c3_286, %c12_287, %c0_288] : memref<2x4x16x16xf32, #tpu.memory_space<vmem>>, vector<2x1x1x16xf32>
    %181 = vector.shape_cast %180 : vector<2x1x1x16xf32> to vector<2x16xf32>
    %c0_289 = arith.constant 0 : index
    %c960 = arith.constant 960 : index
    %182 = vector.load %arg2[%c0_289, %c960] : memref<2x1024xf32, #tpu.memory_space<vmem>>, vector<2x16xf32>
    tpu.vector_store %arg2[%c0_289, %c960], %181 {strides = array<i32>} : memref<2x1024xf32, #tpu.memory_space<vmem>>, vector<2x16xf32>,
    %c0_290 = arith.constant 0 : index
    %c3_291 = arith.constant 3 : index
    %c13_292 = arith.constant 13 : index
    %c0_293 = arith.constant 0 : index
    %183 = vector.load %arg1[%c0_290, %c3_291, %c13_292, %c0_293] : memref<2x4x16x16xf32, #tpu.memory_space<vmem>>, vector<2x1x1x16xf32>
    %184 = vector.shape_cast %183 : vector<2x1x1x16xf32> to vector<2x16xf32>
    %c0_294 = arith.constant 0 : index
    %c976 = arith.constant 976 : index
    %185 = vector.load %arg2[%c0_294, %c976] : memref<2x1024xf32, #tpu.memory_space<vmem>>, vector<2x16xf32>
    tpu.vector_store %arg2[%c0_294, %c976], %184 {strides = array<i32>} : memref<2x1024xf32, #tpu.memory_space<vmem>>, vector<2x16xf32>,
    %c0_295 = arith.constant 0 : index
    %c3_296 = arith.constant 3 : index
    %c14_297 = arith.constant 14 : index
    %c0_298 = arith.constant 0 : index
    %186 = vector.load %arg1[%c0_295, %c3_296, %c14_297, %c0_298] : memref<2x4x16x16xf32, #tpu.memory_space<vmem>>, vector<2x1x1x16xf32>
    %187 = vector.shape_cast %186 : vector<2x1x1x16xf32> to vector<2x16xf32>
    %c0_299 = arith.constant 0 : index
    %c992 = arith.constant 992 : index
    %188 = vector.load %arg2[%c0_299, %c992] : memref<2x1024xf32, #tpu.memory_space<vmem>>, vector<2x16xf32>
    tpu.vector_store %arg2[%c0_299, %c992], %187 {strides = array<i32>} : memref<2x1024xf32, #tpu.memory_space<vmem>>, vector<2x16xf32>,
    %c0_300 = arith.constant 0 : index
    %c3_301 = arith.constant 3 : index
    %c15_302 = arith.constant 15 : index
    %c0_303 = arith.constant 0 : index
    %189 = vector.load %arg1[%c0_300, %c3_301, %c15_302, %c0_303] : memref<2x4x16x16xf32, #tpu.memory_space<vmem>>, vector<2x1x1x16xf32>
    %190 = vector.shape_cast %189 : vector<2x1x1x16xf32> to vector<2x16xf32>
    %c0_304 = arith.constant 0 : index
    %c1008 = arith.constant 1008 : index
    %191 = vector.load %arg2[%c0_304, %c1008] : memref<2x1024xf32, #tpu.memory_space<vmem>>, vector<2x16xf32>
    tpu.vector_store %arg2[%c0_304, %c1008], %190 {strides = array<i32>} : memref<2x1024xf32, #tpu.memory_space<vmem>>, vector<2x16xf32>,
    return
  }
  func.func @transform_0(%arg0: i32) -> (i32, i32, i32, i32) {
    %c0_i32 = arith.constant 0 : i32
    %c0_i32_0 = arith.constant 0 : i32
    %c0_i32_1 = arith.constant 0 : i32
    %c0_i32_2 = arith.constant 0 : i32
    return %arg0, %c0_i32, %c0_i32_0, %c0_i32_1 : i32, i32, i32, i32
  }
  func.func @transform_1(%arg0: i32) -> (i32, i32) {
    %c0_i32 = arith.constant 0 : i32
    %c0_i32_0 = arith.constant 0 : i32
    return %arg0, %c0_i32 : i32, i32
  }
}

</mosaic_0001>

<bundles_post_ra>
// kernel: tpu_custom_call.1
= control target key start
LH: loop header
LB: loop body
LE: loop exit
PB: predicated region body
PF: predicated region fallthrough
CT: control target
= control target key end

     0   :  { %6 = vsyncpa [#allocation3], 0  ;;  %s2481_s0 = inlined_call_operand.hbm [shape: f32[2,4,16,16], index: 0, kind: input, shape index: {}]   ;;  %s2482_s1 = inlined_call_operand.hbm [shape: f32[2,1024], index: 1, kind: output, shape index: {}]  }
   0x1   :  { %7 = vsyncpa [#allocation4], 0  ;;  %s2078_s6 = smov [#allocation2]  }
   0x2   :  { %s13_s7 = sshll.u32 %s2078_s6, 4  ;;  %s14_s7 = int_to_ptr.vmem [resolvable:$true] %s13_s7 }
   0x3   :  { %s2042_s8 = scalar_lea.vmem %s14_s7, 2048  ;;  %p2047_p1 = scmp.lt.s32.totalorder %s14_s7, %s14_s7 }
   0x4   :  { %p2043_p0 = scmp.ne.s32.totalorder %s14_s7, %s2042_s8  ;;  %p2048_p2 = scmp.lt.s32.totalorder %s2042_s8, %s2042_s8 }
   0x6   :  { %p2049_p3 = por %p2048_p2, %p2047_p1 }
   0x8   :  { %p2050_p4 = pnand %p2049_p3, %p2043_p0 }
   0xa   :  { %2053 = shalt.err (!%p2050_p4)
}
   0xb   :  { %s2079_s9 = smov 128   ;;  %s2080_s10 = smov 8  }
   0xc   :  { %19 = dma.hbm_to_vmem [thread:$0]  %s2481_s0, 2048, %s14_s7, [#allocation3], %s2079_s9, %s2079_s9, %s2080_s10  }
   0xd   :  { %2074 = dma.done.wait [#allocation3], 2048  }
   0xe   :  { %2075 = vsyncadd [#allocation3], 4294965248  ;;  %v1901_v0 = vld.sshfl [vmem:[#allocation2 + $0x3] sm:$0x1 pattern:$0x76325410] }
   0xf   :  { %vm46_vm0 = vcmask 1041409   ;;  %v1902_v1 = vld.sshfl [vmem:[#allocation2 + $0x43] sm:$0x1 pattern:$0x76325410]  ;;  %vm48_vm1 = vcmask 1043459  }
  0x10   :  { %v137_v2 = vrot.slane %v1902_v1, 7  ;;  %v1897_v3 = vld.sshfl [vmem:[#allocation2 + $0x1] sm:$0x1 pattern:$0x76325410]  ;;  %vm50_vm2 = vcmask 1045509  }
  0x11   :  { %v1898_v4 = vld.sshfl [vmem:[#allocation2 + $0x41] sm:$0x1 pattern:$0x76325410]  ;;  %vm52_vm3 = vcmask 1047559   ;;  %s2081_s0 = smov 48  }
  0x12   :  { %v138_v5 = vsel %vm46_vm0, %v137_v2, %v1901_v0  ;;  %v77_v6 = vrot.slane %v1898_v4, 7  ;;  %v1903_v7 = vld.sshfl [vmem:[#allocation2 + $0x4] sm:$0x1 pattern:$0x76325410]  ;;  %s2082_s13 = smov 16  }
  0x13   :  { %v139_v8 = vsel %vm48_vm1, %v137_v2, %v138_v5  ;;  %v1904_v9 = vld.sshfl [vmem:[#allocation2 + $0x44] sm:$0x1 pattern:$0x76325410]  ;;  %s2083_s14 = smov 64   ;;  %s2084_s15 = smov 32  }
  0x14   :  { %v140_v10 = vsel %vm50_vm2, %v137_v2, %v139_v8  ;;  %v78_v11 = vsel %vm46_vm0, %v77_v6, %v1897_v3  ;;  %v167_v12 = vrot.slane %v1904_v9, 7  ;;  %v1899_v13 = vld.sshfl [vmem:[#allocation2 + $0x2] sm:$0x1 pattern:$0x76325410]  ;;  %s2085_s16 = smov 96  }
  0x15   :  { %v141_v14 = vsel %vm52_vm3, %v137_v2, %v140_v10  ;;  %v79_v15 = vsel %vm48_vm1, %v77_v6, %v78_v11  ;;  %v1900_v16 = vld.sshfl [vmem:[#allocation2 + $0x42] sm:$0x1 pattern:$0x76325410]  ;;  %s2086_s17 = smov 80   ;;  %s2087_s18 = smov 112  }
  0x16   :  { %142 = vrot.lane.b32.xlu1 %v141_v14, %s2081_s0  ;;  %v80_v17 = vsel %vm50_vm2, %v77_v6, %v79_v15  ;;  %v168_v18 = vsel %vm46_vm0, %v167_v12, %v1903_v7  ;;  %v107_v19 = vrot.slane %v1900_v16, 7  ;;  %v1907_v20 = vld.sshfl [vmem:[#allocation2 + $0x6] sm:$0x1 pattern:$0x76325410]  ;;  %vm55_vm4 = vcmask 123904  }
  0x17   :  { %v81_v21 = vsel %vm52_vm3, %v77_v6, %v80_v17  ;;  %v169_v22 = vsel %vm48_vm1, %v167_v12, %v168_v18  ;;  %v1908_v23 = vld.sshfl [vmem:[#allocation2 + $0x46] sm:$0x1 pattern:$0x76325410]  ;;  %vm85_vm5 = vcmask 255104   ;;  %vm115_vm6 = vcmask 386304  }
  0x18   :  { %82 = vrot.lane.b32.xlu0 %v81_v21, %s2082_s13  ;;  %v170_v24 = vsel %vm50_vm2, %v167_v12, %v169_v22  ;;  %v108_v25 = vsel %vm46_vm0, %v107_v19, %v1899_v13  ;;  %v227_v26 = vrot.slane %v1908_v23, 7  ;;  %v1905_v27 = vld.sshfl [vmem:[#allocation2 + $0x5] sm:$0x1 pattern:$0x76325410]  ;;  %vm145_vm7 = vcmask 517504  }
  0x19   :  { %v171_v28 = vsel %vm52_vm3, %v167_v12, %v170_v24  ;;  %v109_v29 = vsel %vm48_vm1, %v107_v19, %v108_v25  ;;  %v1906_v30 = vld.sshfl [vmem:[#allocation2 + $0x45] sm:$0x1 pattern:$0x76325410]  ;;  %vm175_vm8 = vcmask 648704   ;;  %vm205_vm9 = vcmask 779904  }
  0x1a   :  { %172 = vrot.lane.b32.xlu1 %v171_v28, %s2083_s14  ;;  %v110_v31 = vsel %vm50_vm2, %v107_v19, %v109_v29  ;;  %v228_v32 = vsel %vm46_vm0, %v227_v26, %v1907_v20  ;;  %v197_v33 = vrot.slane %v1906_v30, 7  ;;  %v1913_v34 = vld.sshfl [vmem:[#allocation2 + $0x9] sm:$0x1 pattern:$0x76325410]  ;;  %vm235_vm10 = vcmask 911104  }
  0x1b   :  { %v111_v35 = vsel %vm52_vm3, %v107_v19, %v110_v31  ;;  %v229_v36 = vsel %vm48_vm1, %v227_v26, %v228_v32  ;;  %v1914_v37 = vld.sshfl [vmem:[#allocation2 + $0x49] sm:$0x1 pattern:$0x76325410]  ;;  %vm265_vm11 = vcmask 1042304   ;;  %s2088_s19 = smov [#allocation5]  }
  0x1c   :  { %112 = vrot.lane.b32.xlu0 %v111_v35, %s2084_s15  ;;  %v230_v38 = vsel %vm50_vm2, %v227_v26, %v229_v36  ;;  %v198_v39 = vsel %vm46_vm0, %v197_v33, %v1905_v27  ;;  %v314_v40 = vrot.slane %v1914_v37, 7  ;;  %v1909_v41 = vld.sshfl [vmem:[#allocation2 + $0x7] sm:$0x1 pattern:$0x76325410]  ;;  %s1886_s20 = sshll.u32 %s2088_s19, 4  ;;  %s1887_s20 = int_to_ptr.vmem [resolvable:$true] %s1886_s20 }
  0x1d   :  { %v231_v42 = vsel %vm52_vm3, %v227_v26, %v230_v38  ;;  %v199_v43 = vsel %vm48_vm1, %v197_v33, %v198_v39  ;;  %v1910_v44 = vld.sshfl [vmem:[#allocation2 + $0x47] sm:$0x1 pattern:$0x76325410]  ;;  %s2054_s21 = scalar_lea.vmem %s1887_s20, 256  ;;  %p2059_p6 = scmp.lt.s32.totalorder %s1887_s20, %s1887_s20 }
  0x1e   :  { %232 = vrot.lane.b32.xlu1 %v231_v42, %s2085_s16  ;;  %v200_v45 = vsel %vm50_vm2, %v197_v33, %v199_v43  ;;  %v315_v46 = vsel %vm46_vm0, %v314_v40, %v1913_v34  ;;  %v257_v47 = vrot.slane %v1910_v44, 7  ;;  %v1917_v48 = vld.sshfl [vmem:[#allocation2 + $0xb] sm:$0x1 pattern:$0x76325410]  ;;  %p2055_p5 = scmp.ne.s32.totalorder %s1887_s20, %s2054_s21  ;;  %p2060_p7 = scmp.lt.s32.totalorder %s2054_s21, %s2054_s21 }
  0x1f   :  { %v201_v49 = vsel %vm52_vm3, %v197_v33, %v200_v45  ;;  %v316_v50 = vsel %vm48_vm1, %v314_v40, %v315_v46  ;;  %v1918_v51 = vld.sshfl [vmem:[#allocation2 + $0x4b] sm:$0x1 pattern:$0x76325410] }
  0x20   :  { %202 = vrot.lane.b32.xlu0 %v201_v49, %s2086_s17  ;;  %v317_v52 = vsel %vm50_vm2, %v314_v40, %v316_v50  ;;  %v258_v53 = vsel %vm46_vm0, %v257_v47, %v1909_v41  ;;  %v372_v54 = vrot.slane %v1918_v51, 7  ;;  %v1915_v55 = vld.sshfl [vmem:[#allocation2 + $0xa] sm:$0x1 pattern:$0x76325410]  ;;  %p2061_p8 = por %p2060_p7, %p2059_p6 }
  0x21   :  { %v318_v56 = vsel %vm52_vm3, %v314_v40, %v317_v52  ;;  %v259_v57 = vsel %vm48_vm1, %v257_v47, %v258_v53  ;;  %v1916_v58 = vld.sshfl [vmem:[#allocation2 + $0x4a] sm:$0x1 pattern:$0x76325410] }
  0x22   :  { %319 = vrot.lane.b32.xlu1 %v318_v56, %s2082_s13  ;;  %v260_v59 = vsel %vm50_vm2, %v257_v47, %v259_v57  ;;  %v373_v60 = vsel %vm46_vm0, %v372_v54, %v1917_v48  ;;  %v343_v61 = vrot.slane %v1916_v58, 7  ;;  %v1921_v62 = vld.sshfl [vmem:[#allocation2 + $0xd] sm:$0x1 pattern:$0x76325410]  ;;  %p2062_p9 = pnand %p2061_p8, %p2055_p5 }
  0x23   :  { %v261_v63 = vsel %vm52_vm3, %v257_v47, %v260_v59  ;;  %v374_v0 = vsel %vm48_vm1, %v372_v54, %v373_v60  ;;  %v1922_v1 = vld.sshfl [vmem:[#allocation2 + $0x4d] sm:$0x1 pattern:$0x76325410] }
  0x24   :  { %262 = vrot.lane.b32.xlu0 %v261_v63, %s2087_s18  ;;  %v375_v2 = vsel %vm50_vm2, %v372_v54, %v374_v0  ;;  %v344_v3 = vsel %vm46_vm0, %v343_v61, %v1915_v55  ;;  %v430_v4 = vrot.slane %v1922_v1, 7  ;;  %v1919_v5 = vld.sshfl [vmem:[#allocation2 + $0xc] sm:$0x1 pattern:$0x76325410] }
  0x25   :  { %v376_v6 = vsel %vm52_vm3, %v372_v54, %v375_v2  ;;  %v345_v7 = vsel %vm48_vm1, %v343_v61, %v344_v3  ;;  %v1920_v8 = vld.sshfl [vmem:[#allocation2 + $0x4c] sm:$0x1 pattern:$0x76325410] }
  0x26   :  { %377 = vrot.lane.b32.xlu1 %v376_v6, %s2081_s0  ;;  %v346_v9 = vsel %vm50_vm2, %v343_v61, %v345_v7  ;;  %v431_v10 = vsel %vm46_vm0, %v430_v4, %v1921_v62  ;;  %v401_v11 = vrot.slane %v1920_v8, 7  ;;  %v1925_v12 = vld.sshfl [vmem:[#allocation2 + $0xf] sm:$0x1 pattern:$0x76325410] }
  0x27   :  { %v347_v13 = vsel %vm52_vm3, %v343_v61, %v346_v9  ;;  %v432_v14 = vsel %vm48_vm1, %v430_v4, %v431_v10  ;;  %v1926_v15 = vld.sshfl [vmem:[#allocation2 + $0x4f] sm:$0x1 pattern:$0x76325410] }
  0x28   :  { %348 = vrot.lane.b32.xlu0 %v347_v13, %s2084_s15  ;;  %v433_v16 = vsel %vm50_vm2, %v430_v4, %v432_v14  ;;  %v402_v17 = vsel %vm46_vm0, %v401_v11, %v1919_v5  ;;  %v488_v18 = vrot.slane %v1926_v15, 7  ;;  %v1923_v19 = vld.sshfl [vmem:[#allocation2 + $0xe] sm:$0x1 pattern:$0x76325410] }
  0x29   :  { %v434_v20 = vsel %vm52_vm3, %v430_v4, %v433_v16  ;;  %v403_v21 = vsel %vm48_vm1, %v401_v11, %v402_v17  ;;  %v1924_v22 = vld.sshfl [vmem:[#allocation2 + $0x4e] sm:$0x1 pattern:$0x76325410] }
  0x2a   :  { %435 = vrot.lane.b32.xlu1 %v434_v20, %s2086_s17  ;;  %v404_v23 = vsel %vm50_vm2, %v401_v11, %v403_v21  ;;  %v489_v24 = vsel %vm46_vm0, %v488_v18, %v1925_v12  ;;  %v459_v25 = vrot.slane %v1924_v22, 7  ;;  %v1931_v26 = vld.sshfl [vmem:[#allocation2 + $0x12] sm:$0x1 pattern:$0x76325410] }
  0x2b   :  { %v405_v27 = vsel %vm52_vm3, %v401_v11, %v404_v23  ;;  %v490_v28 = vsel %vm48_vm1, %v488_v18, %v489_v24  ;;  %v1932_v29 = vld.sshfl [vmem:[#allocation2 + $0x52] sm:$0x1 pattern:$0x76325410] }
  0x2c   :  { %406 = vrot.lane.b32.xlu0 %v405_v27, %s2083_s14  ;;  %v491_v30 = vsel %vm50_vm2, %v488_v18, %v490_v28  ;;  %v460_v31 = vsel %vm46_vm0, %v459_v25, %v1923_v19  ;;  %v574_v32 = vrot.slane %v1932_v29, 7  ;;  %v1929_v33 = vld.sshfl [vmem:[#allocation2 + $0x11] sm:$0x1 pattern:$0x76325410] }
  0x2d   :  { %v492_v34 = vsel %vm52_vm3, %v488_v18, %v491_v30  ;;  %v461_v35 = vsel %vm48_vm1, %v459_v25, %v460_v31  ;;  %v1930_v36 = vld.sshfl [vmem:[#allocation2 + $0x51] sm:$0x1 pattern:$0x76325410] }
  0x2e   :  { %493 = vrot.lane.b32.xlu1 %v492_v34, %s2087_s18  ;;  %v462_v37 = vsel %vm50_vm2, %v459_v25, %v461_v35  ;;  %v575_v38 = vsel %vm46_vm0, %v574_v32, %v1931_v26  ;;  %v545_v39 = vrot.slane %v1930_v36, 7  ;;  %v1935_v40 = vld.sshfl [vmem:[#allocation2 + $0x14] sm:$0x1 pattern:$0x76325410] }
  0x2f   :  { %v463_v41 = vsel %vm52_vm3, %v459_v25, %v462_v37  ;;  %v576_v42 = vsel %vm48_vm1, %v574_v32, %v575_v38  ;;  %v1936_v43 = vld.sshfl [vmem:[#allocation2 + $0x54] sm:$0x1 pattern:$0x76325410] }
  0x30   :  { %464 = vrot.lane.b32.xlu0 %v463_v41, %s2085_s16  ;;  %v577_v44 = vsel %vm50_vm2, %v574_v32, %v576_v42  ;;  %v546_v45 = vsel %vm46_vm0, %v545_v39, %v1929_v33  ;;  %v632_v46 = vrot.slane %v1936_v43, 7  ;;  %v1933_v47 = vld.sshfl [vmem:[#allocation2 + $0x13] sm:$0x1 pattern:$0x76325410] }
  0x31   :  { %v578_v48 = vsel %vm52_vm3, %v574_v32, %v577_v44  ;;  %v547_v49 = vsel %vm48_vm1, %v545_v39, %v546_v45  ;;  %v1934_v50 = vld.sshfl [vmem:[#allocation2 + $0x53] sm:$0x1 pattern:$0x76325410] }
  0x32   :  { %579 = vrot.lane.b32.xlu1 %v578_v48, %s2084_s15  ;;  %v548_v51 = vsel %vm50_vm2, %v545_v39, %v547_v49  ;;  %v633_v52 = vsel %vm46_vm0, %v632_v46, %v1935_v40  ;;  %v603_v53 = vrot.slane %v1934_v50, 7  ;;  %v1939_v54 = vld.sshfl [vmem:[#allocation2 + $0x16] sm:$0x1 pattern:$0x76325410] }
  0x33   :  { %v549_v55 = vsel %vm52_vm3, %v545_v39, %v548_v51  ;;  %v634_v56 = vsel %vm48_vm1, %v632_v46, %v633_v52  ;;  %v1940_v57 = vld.sshfl [vmem:[#allocation2 + $0x56] sm:$0x1 pattern:$0x76325410] }
  0x34   :  { %550 = vrot.lane.b32.xlu0 %v549_v55, %s2082_s13  ;;  %v635_v58 = vsel %vm50_vm2, %v632_v46, %v634_v56  ;;  %v604_v59 = vsel %vm46_vm0, %v603_v53, %v1933_v47  ;;  %v690_v60 = vrot.slane %v1940_v57, 7  ;;  %v1937_v61 = vld.sshfl [vmem:[#allocation2 + $0x15] sm:$0x1 pattern:$0x76325410] }
  0x35   :  { %v636_v62 = vsel %vm52_vm3, %v632_v46, %v635_v58  ;;  %v605_v63 = vsel %vm48_vm1, %v603_v53, %v604_v59  ;;  %v1938_v0 = vld.sshfl [vmem:[#allocation2 + $0x55] sm:$0x1 pattern:$0x76325410] }
  0x36   :  { %637 = vrot.lane.b32.xlu1 %v636_v62, %s2083_s14  ;;  %v606_v1 = vsel %vm50_vm2, %v603_v53, %v605_v63  ;;  %v691_v2 = vsel %vm46_vm0, %v690_v60, %v1939_v54  ;;  %v661_v3 = vrot.slane %v1938_v0, 7  ;;  %v1945_v4 = vld.sshfl [vmem:[#allocation2 + $0x19] sm:$0x1 pattern:$0x76325410] }
  0x37   :  { %v607_v5 = vsel %vm52_vm3, %v603_v53, %v606_v1  ;;  %v692_v6 = vsel %vm48_vm1, %v690_v60, %v691_v2  ;;  %v1946_v7 = vld.sshfl [vmem:[#allocation2 + $0x59] sm:$0x1 pattern:$0x76325410] }
  0x38   :  { %608 = vrot.lane.b32.xlu0 %v607_v5, %s2081_s0  ;;  %v693_v8 = vsel %vm50_vm2, %v690_v60, %v692_v6  ;;  %v662_v9 = vsel %vm46_vm0, %v661_v3, %v1937_v61  ;;  %v775_v10 = vrot.slane %v1946_v7, 7  ;;  %v1941_v11 = vld.sshfl [vmem:[#allocation2 + $0x17] sm:$0x1 pattern:$0x76325410] }
  0x39   :  { %v694_v12 = vsel %vm52_vm3, %v690_v60, %v693_v8  ;;  %v663_v13 = vsel %vm48_vm1, %v661_v3, %v662_v9  ;;  %v1942_v14 = vld.sshfl [vmem:[#allocation2 + $0x57] sm:$0x1 pattern:$0x76325410] }
  0x3a   :  { %695 = vrot.lane.b32.xlu1 %v694_v12, %s2085_s16  ;;  %v664_v15 = vsel %vm50_vm2, %v661_v3, %v663_v13  ;;  %v776_v16 = vsel %vm46_vm0, %v775_v10, %v1945_v4  ;;  %v719_v17 = vrot.slane %v1942_v14, 7  ;;  %v1949_v18 = vld.sshfl [vmem:[#allocation2 + $0x1b] sm:$0x1 pattern:$0x76325410] }
  0x3b   :  { %v665_v19 = vsel %vm52_vm3, %v661_v3, %v664_v15  ;;  %v777_v20 = vsel %vm48_vm1, %v775_v10, %v776_v16  ;;  %v1950_v21 = vld.sshfl [vmem:[#allocation2 + $0x5b] sm:$0x1 pattern:$0x76325410] }
  0x3c   :  { %666 = vrot.lane.b32.xlu0 %v665_v19, %s2086_s17  ;;  %v778_v22 = vsel %vm50_vm2, %v775_v10, %v777_v20  ;;  %v720_v23 = vsel %vm46_vm0, %v719_v17, %v1941_v11  ;;  %v833_v24 = vrot.slane %v1950_v21, 7  ;;  %v1947_v25 = vld.sshfl [vmem:[#allocation2 + $0x1a] sm:$0x1 pattern:$0x76325410] }
  0x3d   :  { %v779_v26 = vsel %vm52_vm3, %v775_v10, %v778_v22  ;;  %v721_v27 = vsel %vm48_vm1, %v719_v17, %v720_v23  ;;  %v1948_v28 = vld.sshfl [vmem:[#allocation2 + $0x5a] sm:$0x1 pattern:$0x76325410] }
  0x3e   :  { %780 = vrot.lane.b32.xlu1 %v779_v26, %s2082_s13  ;;  %v722_v29 = vsel %vm50_vm2, %v719_v17, %v721_v27  ;;  %v834_v30 = vsel %vm46_vm0, %v833_v24, %v1949_v18  ;;  %v804_v31 = vrot.slane %v1948_v28, 7  ;;  %v1977_v32 = vld.sshfl [vmem:[#allocation2 + $0x29] sm:$0x1 pattern:$0x76325410] }
  0x3f   :  { %v723_v33 = vsel %vm52_vm3, %v719_v17, %v722_v29  ;;  %v835_v34 = vsel %vm48_vm1, %v833_v24, %v834_v30  ;;  %v1978_v35 = vld.sshfl [vmem:[#allocation2 + $0x69] sm:$0x1 pattern:$0x76325410] }
  0x40   :  { %724 = vrot.lane.b32.xlu0 %v723_v33, %s2087_s18  ;;  %v836_v36 = vsel %vm50_vm2, %v833_v24, %v835_v34  ;;  %v805_v37 = vsel %vm46_vm0, %v804_v31, %v1947_v25  ;;  %v1236_v38 = vrot.slane %v1978_v35, 7  ;;  %v1961_v39 = vld.sshfl [vmem:[#allocation2 + $0x21] sm:$0x1 pattern:$0x76325410] }
  0x41   :  { %v837_v40 = vsel %vm52_vm3, %v833_v24, %v836_v36  ;;  %v806_v41 = vsel %vm48_vm1, %v804_v31, %v805_v37  ;;  %v1962_v42 = vld.sshfl [vmem:[#allocation2 + $0x61] sm:$0x1 pattern:$0x76325410] }
  0x42   :  { %838 = vrot.lane.b32.xlu1 %v837_v40, %s2081_s0  ;;  %v807_v43 = vsel %vm50_vm2, %v804_v31, %v806_v41  ;;  %v1237_v44 = vsel %vm46_vm0, %v1236_v38, %v1977_v32  ;;  %v1006_v45 = vrot.slane %v1962_v42, 7  ;;  %v2009_v46 = vld.sshfl [vmem:[#allocation2 + $0x39] sm:$0x1 pattern:$0x76325410] }
  0x43   :  { %v808_v47 = vsel %vm52_vm3, %v804_v31, %v807_v43  ;;  %v1238_v48 = vsel %vm48_vm1, %v1236_v38, %v1237_v44  ;;  %v2010_v49 = vld.sshfl [vmem:[#allocation2 + $0x79] sm:$0x1 pattern:$0x76325410] }
  0x44   :  { %809 = vrot.lane.b32.xlu0 %v808_v47, %s2084_s15  ;;  %v1239_v50 = vsel %vm50_vm2, %v1236_v38, %v1238_v48  ;;  %v1007_v51 = vsel %vm46_vm0, %v1006_v45, %v1961_v39  ;;  %v1697_v52 = vrot.slane %v2010_v49, 7  ;;  %v1993_v53 = vld.sshfl [vmem:[#allocation2 + $0x31] sm:$0x1 pattern:$0x76325410] }
  0x45   :  { %v1240_v54 = vsel %vm52_vm3, %v1236_v38, %v1239_v50  ;;  %v1008_v55 = vsel %vm48_vm1, %v1006_v45, %v1007_v51  ;;  %v1994_v56 = vld.sshfl [vmem:[#allocation2 + $0x71] sm:$0x1 pattern:$0x76325410] }
  0x46   :  { %1241 = vrot.lane.b32.xlu1 %v1240_v54, %s2082_s13  ;;  %v1009_v57 = vsel %vm50_vm2, %v1006_v45, %v1008_v55  ;;  %v1698_v58 = vsel %vm46_vm0, %v1697_v52, %v2009_v46  ;;  %v1467_v59 = vrot.slane %v1994_v56, 7  ;;  %v1979_v60 = vld.sshfl [vmem:[#allocation2 + $0x2a] sm:$0x1 pattern:$0x76325410] }
  0x47   :  { %v1010_v61 = vsel %vm52_vm3, %v1006_v45, %v1009_v57  ;;  %v1699_v62 = vsel %vm48_vm1, %v1697_v52, %v1698_v58  ;;  %v1980_v63 = vld.sshfl [vmem:[#allocation2 + $0x6a] sm:$0x1 pattern:$0x76325410] }
  0x48   :  { %1011 = vrot.lane.b32.xlu0 %v1010_v61, %s2082_s13  ;;  %v1700_v0 = vsel %vm50_vm2, %v1697_v52, %v1699_v62  ;;  %v1468_v1 = vsel %vm46_vm0, %v1467_v59, %v1993_v53  ;;  %v1265_v2 = vrot.slane %v1980_v63, 7  ;;  %v1963_v3 = vld.sshfl [vmem:[#allocation2 + $0x22] sm:$0x1 pattern:$0x76325410] }
  0x49   :  { %v1701_v4 = vsel %vm52_vm3, %v1697_v52, %v1700_v0  ;;  %v1469_v5 = vsel %vm48_vm1, %v1467_v59, %v1468_v1  ;;  %v1964_v6 = vld.sshfl [vmem:[#allocation2 + $0x62] sm:$0x1 pattern:$0x76325410] }
  0x4a   :  { %1702 = vrot.lane.b32.xlu1 %v1701_v4, %s2082_s13  ;;  %v1470_v7 = vsel %vm50_vm2, %v1467_v59, %v1469_v5  ;;  %v1266_v8 = vsel %vm46_vm0, %v1265_v2, %v1979_v60  ;;  %v1035_v9 = vrot.slane %v1964_v6, 7  ;;  %v2011_v10 = vld.sshfl [vmem:[#allocation2 + $0x3a] sm:$0x1 pattern:$0x76325410] }
  0x4b   :  { %v1471_v11 = vsel %vm52_vm3, %v1467_v59, %v1470_v7  ;;  %v1267_v12 = vsel %vm48_vm1, %v1265_v2, %v1266_v8  ;;  %v2012_v13 = vld.sshfl [vmem:[#allocation2 + $0x7a] sm:$0x1 pattern:$0x76325410] }
  0x4c   :  { %1472 = vrot.lane.b32.xlu0 %v1471_v11, %s2082_s13  ;;  %v1268_v14 = vsel %vm50_vm2, %v1265_v2, %v1267_v12  ;;  %v1036_v15 = vsel %vm46_vm0, %v1035_v9, %v1963_v3  ;;  %v1726_v16 = vrot.slane %v2012_v13, 7  ;;  %v1995_v17 = vld.sshfl [vmem:[#allocation2 + $0x32] sm:$0x1 pattern:$0x76325410] }
  0x4d   :  { %v1269_v18 = vsel %vm52_vm3, %v1265_v2, %v1268_v14  ;;  %v1037_v19 = vsel %vm48_vm1, %v1035_v9, %v1036_v15  ;;  %v1996_v20 = vld.sshfl [vmem:[#allocation2 + $0x72] sm:$0x1 pattern:$0x76325410] }
  0x4e   :  { %1270 = vrot.lane.b32.xlu1 %v1269_v18, %s2084_s15  ;;  %v1038_v21 = vsel %vm50_vm2, %v1035_v9, %v1037_v19  ;;  %v1727_v22 = vsel %vm46_vm0, %v1726_v16, %v2011_v10  ;;  %v1496_v23 = vrot.slane %v1996_v20, 7  ;;  %v1981_v24 = vld.sshfl [vmem:[#allocation2 + $0x2b] sm:$0x1 pattern:$0x76325410] }
  0x4f   :  { %v1039_v25 = vsel %vm52_vm3, %v1035_v9, %v1038_v21  ;;  %v1728_v26 = vsel %vm48_vm1, %v1726_v16, %v1727_v22  ;;  %v1982_v27 = vld.sshfl [vmem:[#allocation2 + $0x6b] sm:$0x1 pattern:$0x76325410] }
  0x50   :  { %1040 = vrot.lane.b32.xlu0 %v1039_v25, %s2084_s15  ;;  %v1729_v28 = vsel %vm50_vm2, %v1726_v16, %v1728_v26  ;;  %v1497_v29 = vsel %vm46_vm0, %v1496_v23, %v1995_v17  ;;  %v1294_v30 = vrot.slane %v1982_v27, 7  ;;  %v1965_v31 = vld.sshfl [vmem:[#allocation2 + $0x23] sm:$0x1 pattern:$0x76325410] }
  0x51   :  { %v1730_v32 = vsel %vm52_vm3, %v1726_v16, %v1729_v28  ;;  %v1498_v33 = vsel %vm48_vm1, %v1496_v23, %v1497_v29  ;;  %v1966_v34 = vld.sshfl [vmem:[#allocation2 + $0x63] sm:$0x1 pattern:$0x76325410] }
  0x52   :  { %1731 = vrot.lane.b32.xlu1 %v1730_v32, %s2084_s15  ;;  %v1499_v35 = vsel %vm50_vm2, %v1496_v23, %v1498_v33  ;;  %v1295_v36 = vsel %vm46_vm0, %v1294_v30, %v1981_v24  ;;  %v1064_v37 = vrot.slane %v1966_v34, 7  ;;  %v2013_v38 = vld.sshfl [vmem:[#allocation2 + $0x3b] sm:$0x1 pattern:$0x76325410] }
  0x53   :  { %v1500_v39 = vsel %vm52_vm3, %v1496_v23, %v1499_v35  ;;  %v1296_v40 = vsel %vm48_vm1, %v1294_v30, %v1295_v36  ;;  %v2014_v41 = vld.sshfl [vmem:[#allocation2 + $0x7b] sm:$0x1 pattern:$0x76325410] }
  0x54   :  { %1501 = vrot.lane.b32.xlu0 %v1500_v39, %s2084_s15  ;;  %v1297_v42 = vsel %vm50_vm2, %v1294_v30, %v1296_v40  ;;  %v1065_v43 = vsel %vm46_vm0, %v1064_v37, %v1965_v31  ;;  %v1755_v44 = vrot.slane %v2014_v41, 7  ;;  %v1997_v45 = vld.sshfl [vmem:[#allocation2 + $0x33] sm:$0x1 pattern:$0x76325410] }
  0x55   :  { %v1298_v46 = vsel %vm52_vm3, %v1294_v30, %v1297_v42  ;;  %v1066_v47 = vsel %vm48_vm1, %v1064_v37, %v1065_v43  ;;  %v1998_v48 = vld.sshfl [vmem:[#allocation2 + $0x73] sm:$0x1 pattern:$0x76325410] }
  0x56   :  { %1299 = vrot.lane.b32.xlu1 %v1298_v46, %s2081_s0  ;;  %v1067_v49 = vsel %vm50_vm2, %v1064_v37, %v1066_v47  ;;  %v1756_v50 = vsel %vm46_vm0, %v1755_v44, %v2013_v38  ;;  %v1525_v51 = vrot.slane %v1998_v48, 7  ;;  %v1967_v52 = vld.sshfl [vmem:[#allocation2 + $0x24] sm:$0x1 pattern:$0x76325410] }
  0x57   :  { %v1068_v53 = vsel %vm52_vm3, %v1064_v37, %v1067_v49  ;;  %v1757_v54 = vsel %vm48_vm1, %v1755_v44, %v1756_v50  ;;  %v1968_v55 = vld.sshfl [vmem:[#allocation2 + $0x64] sm:$0x1 pattern:$0x76325410] }
  0x58   :  { %1069 = vrot.lane.b32.xlu0 %v1068_v53, %s2081_s0  ;;  %v1758_v56 = vsel %vm50_vm2, %v1755_v44, %v1757_v54  ;;  %v1526_v57 = vsel %vm46_vm0, %v1525_v51, %v1997_v45  ;;  %v1093_v58 = vrot.slane %v1968_v55, 7  ;;  %v1951_v59 = vld.sshfl [vmem:[#allocation2 + $0x1c] sm:$0x1 pattern:$0x76325410] }
  0x59   :  { %v1759_v60 = vsel %vm52_vm3, %v1755_v44, %v1758_v56  ;;  %v1527_v61 = vsel %vm48_vm1, %v1525_v51, %v1526_v57  ;;  %v1952_v62 = vld.sshfl [vmem:[#allocation2 + $0x5c] sm:$0x1 pattern:$0x76325410] }
  0x5a   :  { %1760 = vrot.lane.b32.xlu1 %v1759_v60, %s2081_s0  ;;  %v1528_v63 = vsel %vm50_vm2, %v1525_v51, %v1527_v61  ;;  %v1094_v0 = vsel %vm46_vm0, %v1093_v58, %v1967_v52  ;;  %v862_v1 = vrot.slane %v1952_v62, 7  ;;  %v1999_v2 = vld.sshfl [vmem:[#allocation2 + $0x34] sm:$0x1 pattern:$0x76325410] }
  0x5b   :  { %v1529_v3 = vsel %vm52_vm3, %v1525_v51, %v1528_v63  ;;  %v1095_v4 = vsel %vm48_vm1, %v1093_v58, %v1094_v0  ;;  %v2000_v5 = vld.sshfl [vmem:[#allocation2 + $0x74] sm:$0x1 pattern:$0x76325410] }
  0x5c   :  { %1530 = vrot.lane.b32.xlu0 %v1529_v3, %s2081_s0  ;;  %v1096_v6 = vsel %vm50_vm2, %v1093_v58, %v1095_v4  ;;  %v863_v7 = vsel %vm46_vm0, %v862_v1, %v1951_v59  ;;  %v1554_v8 = vrot.slane %v2000_v5, 7  ;;  %v1983_v9 = vld.sshfl [vmem:[#allocation2 + $0x2c] sm:$0x1 pattern:$0x76325410] }
  0x5d   :  { %v1097_v10 = vsel %vm52_vm3, %v1093_v58, %v1096_v6  ;;  %v864_v11 = vsel %vm48_vm1, %v862_v1, %v863_v7  ;;  %v1984_v12 = vld.sshfl [vmem:[#allocation2 + $0x6c] sm:$0x1 pattern:$0x76325410] }
  0x5e   :  { %1098 = vrot.lane.b32.xlu1 %v1097_v10, %s2083_s14  ;;  %v865_v13 = vsel %vm50_vm2, %v862_v1, %v864_v11  ;;  %v1555_v14 = vsel %vm46_vm0, %v1554_v8, %v1999_v2  ;;  %v1323_v15 = vrot.slane %v1984_v12, 7  ;;  %v1953_v16 = vld.sshfl [vmem:[#allocation2 + $0x1d] sm:$0x1 pattern:$0x76325410] }
  0x5f   :  { %v866_v17 = vsel %vm52_vm3, %v862_v1, %v865_v13  ;;  %v1556_v18 = vsel %vm48_vm1, %v1554_v8, %v1555_v14  ;;  %v1954_v19 = vld.sshfl [vmem:[#allocation2 + $0x5d] sm:$0x1 pattern:$0x76325410] }
  0x60   :  { %867 = vrot.lane.b32.xlu0 %v866_v17, %s2083_s14  ;;  %v1557_v20 = vsel %vm50_vm2, %v1554_v8, %v1556_v18  ;;  %v1324_v21 = vsel %vm46_vm0, %v1323_v15, %v1983_v9  ;;  %v891_v22 = vrot.slane %v1954_v19, 7  ;;  %v2015_v23 = vld.sshfl [vmem:[#allocation2 + $0x3c] sm:$0x1 pattern:$0x76325410] }
  0x61   :  { %v1558_v24 = vsel %vm52_vm3, %v1554_v8, %v1557_v20  ;;  %v1325_v25 = vsel %vm48_vm1, %v1323_v15, %v1324_v21  ;;  %v2016_v26 = vld.sshfl [vmem:[#allocation2 + $0x7c] sm:$0x1 pattern:$0x76325410] }
  0x62   :  { %1559 = vrot.lane.b32.xlu1 %v1558_v24, %s2083_s14  ;;  %v1326_v27 = vsel %vm50_vm2, %v1323_v15, %v1325_v25  ;;  %v892_v28 = vsel %vm46_vm0, %v891_v22, %v1953_v16  ;;  %v1784_v29 = vrot.slane %v2016_v26, 7  ;;  %v1985_v30 = vld.sshfl [vmem:[#allocation2 + $0x2d] sm:$0x1 pattern:$0x76325410] }
  0x63   :  { %v1327_v31 = vsel %vm52_vm3, %v1323_v15, %v1326_v27  ;;  %v893_v32 = vsel %vm48_vm1, %v891_v22, %v892_v28  ;;  %v1986_v33 = vld.sshfl [vmem:[#allocation2 + $0x6d] sm:$0x1 pattern:$0x76325410] }
  0x64   :  { %1328 = vrot.lane.b32.xlu0 %v1327_v31, %s2083_s14  ;;  %v894_v34 = vsel %vm50_vm2, %v891_v22, %v893_v32  ;;  %v1785_v35 = vsel %vm46_vm0, %v1784_v29, %v2015_v23  ;;  %v1352_v36 = vrot.slane %v1986_v33, 7  ;;  %v1969_v37 = vld.sshfl [vmem:[#allocation2 + $0x25] sm:$0x1 pattern:$0x76325410] }
  0x65   :  { %v895_v38 = vsel %vm52_vm3, %v891_v22, %v894_v34  ;;  %v1786_v39 = vsel %vm48_vm1, %v1784_v29, %v1785_v35  ;;  %v1970_v40 = vld.sshfl [vmem:[#allocation2 + $0x65] sm:$0x1 pattern:$0x76325410] }
  0x66   :  { %896 = vrot.lane.b32.xlu1 %v895_v38, %s2086_s17  ;;  %v1787_v41 = vsel %vm50_vm2, %v1784_v29, %v1786_v39  ;;  %v1353_v42 = vsel %vm46_vm0, %v1352_v36, %v1985_v30  ;;  %v1122_v43 = vrot.slane %v1970_v40, 7  ;;  %v2017_v44 = vld.sshfl [vmem:[#allocation2 + $0x3d] sm:$0x1 pattern:$0x76325410] }
  0x67   :  { %v1788_v45 = vsel %vm52_vm3, %v1784_v29, %v1787_v41  ;;  %v1354_v46 = vsel %vm48_vm1, %v1352_v36, %v1353_v42  ;;  %v2018_v47 = vld.sshfl [vmem:[#allocation2 + $0x7d] sm:$0x1 pattern:$0x76325410] }
  0x68   :  { %1789 = vrot.lane.b32.xlu0 %v1788_v45, %s2083_s14  ;;  %v1355_v48 = vsel %vm50_vm2, %v1352_v36, %v1354_v46  ;;  %v1123_v49 = vsel %vm46_vm0, %v1122_v43, %v1969_v37  ;;  %v1813_v50 = vrot.slane %v2018_v47, 7  ;;  %v2001_v51 = vld.sshfl [vmem:[#allocation2 + $0x35] sm:$0x1 pattern:$0x76325410] }
  0x69   :  { %v1356_v52 = vsel %vm52_vm3, %v1352_v36, %v1355_v48  ;;  %v1124_v53 = vsel %vm48_vm1, %v1122_v43, %v1123_v49  ;;  %v2002_v54 = vld.sshfl [vmem:[#allocation2 + $0x75] sm:$0x1 pattern:$0x76325410] }
  0x6a   :  { %1357 = vrot.lane.b32.xlu1 %v1356_v52, %s2086_s17  ;;  %v1125_v55 = vsel %vm50_vm2, %v1122_v43, %v1124_v53  ;;  %v1814_v56 = vsel %vm46_vm0, %v1813_v50, %v2017_v44  ;;  %v1583_v57 = vrot.slane %v2002_v54, 7  ;;  %v1971_v58 = vld.sshfl [vmem:[#allocation2 + $0x26] sm:$0x1 pattern:$0x76325410] }
  0x6b   :  { %v1126_v59 = vsel %vm52_vm3, %v1122_v43, %v1125_v55  ;;  %v1815_v60 = vsel %vm48_vm1, %v1813_v50, %v1814_v56  ;;  %v1972_v61 = vld.sshfl [vmem:[#allocation2 + $0x66] sm:$0x1 pattern:$0x76325410] }
  0x6c   :  { %1127 = vrot.lane.b32.xlu0 %v1126_v59, %s2086_s17  ;;  %v1816_v62 = vsel %vm50_vm2, %v1813_v50, %v1815_v60  ;;  %v1584_v63 = vsel %vm46_vm0, %v1583_v57, %v2001_v51  ;;  %v1151_v0 = vrot.slane %v1972_v61, 7  ;;  %v1955_v1 = vld.sshfl [vmem:[#allocation2 + $0x1e] sm:$0x1 pattern:$0x76325410] }
  0x6d   :  { %v1817_v2 = vsel %vm52_vm3, %v1813_v50, %v1816_v62  ;;  %v1585_v3 = vsel %vm48_vm1, %v1583_v57, %v1584_v63  ;;  %v1956_v4 = vld.sshfl [vmem:[#allocation2 + $0x5e] sm:$0x1 pattern:$0x76325410] }
  0x6e   :  { %1818 = vrot.lane.b32.xlu1 %v1817_v2, %s2086_s17  ;;  %v1586_v5 = vsel %vm50_vm2, %v1583_v57, %v1585_v3  ;;  %v1152_v6 = vsel %vm46_vm0, %v1151_v0, %v1971_v58  ;;  %v920_v7 = vrot.slane %v1956_v4, 7  ;;  %v2003_v8 = vld.sshfl [vmem:[#allocation2 + $0x36] sm:$0x1 pattern:$0x76325410] }
  0x6f   :  { %v1587_v9 = vsel %vm52_vm3, %v1583_v57, %v1586_v5  ;;  %v1153_v10 = vsel %vm48_vm1, %v1151_v0, %v1152_v6  ;;  %v2004_v11 = vld.sshfl [vmem:[#allocation2 + $0x76] sm:$0x1 pattern:$0x76325410] }
  0x70   :  { %1588 = vrot.lane.b32.xlu0 %v1587_v9, %s2086_s17  ;;  %v1154_v12 = vsel %vm50_vm2, %v1151_v0, %v1153_v10  ;;  %v921_v13 = vsel %vm46_vm0, %v920_v7, %v1955_v1  ;;  %v1612_v14 = vrot.slane %v2004_v11, 7  ;;  %v1987_v15 = vld.sshfl [vmem:[#allocation2 + $0x2e] sm:$0x1 pattern:$0x76325410] }
  0x71   :  { %v1155_v16 = vsel %vm52_vm3, %v1151_v0, %v1154_v12  ;;  %v922_v17 = vsel %vm48_vm1, %v920_v7, %v921_v13  ;;  %v1988_v18 = vld.sshfl [vmem:[#allocation2 + $0x6e] sm:$0x1 pattern:$0x76325410] }
  0x72   :  { %1156 = vrot.lane.b32.xlu1 %v1155_v16, %s2085_s16  ;;  %v923_v19 = vsel %vm50_vm2, %v920_v7, %v922_v17  ;;  %v1613_v20 = vsel %vm46_vm0, %v1612_v14, %v2003_v8  ;;  %v1381_v21 = vrot.slane %v1988_v18, 7  ;;  %v1957_v22 = vld.sshfl [vmem:[#allocation2 + $0x1f] sm:$0x1 pattern:$0x76325410] }
  0x73   :  { %v924_v23 = vsel %vm52_vm3, %v920_v7, %v923_v19  ;;  %v1614_v24 = vsel %vm48_vm1, %v1612_v14, %v1613_v20  ;;  %v1958_v25 = vld.sshfl [vmem:[#allocation2 + $0x5f] sm:$0x1 pattern:$0x76325410] }
  0x74   :  { %925 = vrot.lane.b32.xlu0 %v924_v23, %s2085_s16  ;;  %v1615_v26 = vsel %vm50_vm2, %v1612_v14, %v1614_v24  ;;  %v1382_v27 = vsel %vm46_vm0, %v1381_v21, %v1987_v15  ;;  %v949_v28 = vrot.slane %v1958_v25, 7  ;;  %v2019_v29 = vld.sshfl [vmem:[#allocation2 + $0x3e] sm:$0x1 pattern:$0x76325410] }
  0x75   :  { %v1616_v30 = vsel %vm52_vm3, %v1612_v14, %v1615_v26  ;;  %v1383_v31 = vsel %vm48_vm1, %v1381_v21, %v1382_v27  ;;  %v2020_v32 = vld.sshfl [vmem:[#allocation2 + $0x7e] sm:$0x1 pattern:$0x76325410] }
  0x76   :  { %1617 = vrot.lane.b32.xlu1 %v1616_v30, %s2085_s16  ;;  %v1384_v33 = vsel %vm50_vm2, %v1381_v21, %v1383_v31  ;;  %v950_v34 = vsel %vm46_vm0, %v949_v28, %v1957_v22  ;;  %v1842_v35 = vrot.slane %v2020_v32, 7  ;;  %v1989_v36 = vld.sshfl [vmem:[#allocation2 + $0x2f] sm:$0x1 pattern:$0x76325410] }
  0x77   :  { %v1385_v37 = vsel %vm52_vm3, %v1381_v21, %v1384_v33  ;;  %v951_v38 = vsel %vm48_vm1, %v949_v28, %v950_v34  ;;  %v1990_v39 = vld.sshfl [vmem:[#allocation2 + $0x6f] sm:$0x1 pattern:$0x76325410] }
  0x78   :  { %1386 = vrot.lane.b32.xlu0 %v1385_v37, %s2085_s16  ;;  %v952_v40 = vsel %vm50_vm2, %v949_v28, %v951_v38  ;;  %v1843_v41 = vsel %vm46_vm0, %v1842_v35, %v2019_v29  ;;  %v1410_v42 = vrot.slane %v1990_v39, 7  ;;  %v1973_v43 = vld.sshfl [vmem:[#allocation2 + $0x27] sm:$0x1 pattern:$0x76325410] }
  0x79   :  { %v953_v44 = vsel %vm52_vm3, %v949_v28, %v952_v40  ;;  %v1844_v45 = vsel %vm48_vm1, %v1842_v35, %v1843_v41  ;;  %v1974_v46 = vld.sshfl [vmem:[#allocation2 + $0x67] sm:$0x1 pattern:$0x76325410] }
  0x7a   :  { %954 = vrot.lane.b32.xlu1 %v953_v44, %s2087_s18  ;;  %v1845_v47 = vsel %vm50_vm2, %v1842_v35, %v1844_v45  ;;  %v1411_v48 = vsel %vm46_vm0, %v1410_v42, %v1989_v36  ;;  %v1180_v49 = vrot.slane %v1974_v46, 7  ;;  %v2021_v50 = vld.sshfl [vmem:[#allocation2 + $0x3f] sm:$0x1 pattern:$0x76325410] }
  0x7b   :  { %v1846_v51 = vsel %vm52_vm3, %v1842_v35, %v1845_v47  ;;  %v1412_v52 = vsel %vm48_vm1, %v1410_v42, %v1411_v48  ;;  %v2022_v53 = vld.sshfl [vmem:[#allocation2 + $0x7f] sm:$0x1 pattern:$0x76325410] }
  0x7c   :  { %1847 = vrot.lane.b32.xlu0 %v1846_v51, %s2085_s16  ;;  %v1413_v54 = vsel %vm50_vm2, %v1410_v42, %v1412_v52  ;;  %v1181_v55 = vsel %vm46_vm0, %v1180_v49, %v1973_v43  ;;  %v1871_v56 = vrot.slane %v2022_v53, 7  ;;  %v2005_v57 = vld.sshfl [vmem:[#allocation2 + $0x37] sm:$0x1 pattern:$0x76325410] }
  0x7d   :  { %v1414_v58 = vsel %vm52_vm3, %v1410_v42, %v1413_v54  ;;  %v1182_v59 = vsel %vm48_vm1, %v1180_v49, %v1181_v55  ;;  %v2006_v60 = vld.sshfl [vmem:[#allocation2 + $0x77] sm:$0x1 pattern:$0x76325410] }
  0x7e   :  { %1415 = vrot.lane.b32.xlu1 %v1414_v58, %s2087_s18  ;;  %v1183_v61 = vsel %vm50_vm2, %v1180_v49, %v1182_v59  ;;  %v1872_v62 = vsel %vm46_vm0, %v1871_v56, %v2021_v50  ;;  %v1641_v63 = vrot.slane %v2006_v60, 7  ;;  %v1895_v0 = vld.sshfl [vmem:[#allocation2] sm:$0x1 pattern:$0x76325410] }
  0x7f   :  { %v1184_v1 = vsel %vm52_vm3, %v1180_v49, %v1183_v61  ;;  %v1873_v2 = vsel %vm48_vm1, %v1871_v56, %v1872_v62  ;;  %v1896_v3 = vld.sshfl [vmem:[#allocation2 + $0x40] sm:$0x1 pattern:$0x76325410] }
  0x80   :  { %1185 = vrot.lane.b32.xlu0 %v1184_v1, %s2087_s18  ;;  %v1874_v4 = vsel %vm50_vm2, %v1871_v56, %v1873_v2  ;;  %v1642_v5 = vsel %vm46_vm0, %v1641_v63, %v2005_v57  ;;  %v45_v6 = vrot.slane %v1896_v3, 7  ;;  %v1911_v7 = vld.sshfl [vmem:[#allocation2 + $0x8] sm:$0x1 pattern:$0x76325410] }
  0x81   :  { %v1875_v8 = vsel %vm52_vm3, %v1871_v56, %v1874_v4  ;;  %v1643_v9 = vsel %vm48_vm1, %v1641_v63, %v1642_v5  ;;  %v1912_v10 = vld.sshfl [vmem:[#allocation2 + $0x48] sm:$0x1 pattern:$0x76325410] }
  0x82   :  { %1876 = vrot.lane.b32.xlu1 %v1875_v8, %s2087_s18  ;;  %v1644_v11 = vsel %vm50_vm2, %v1641_v63, %v1643_v9  ;;  %v47_v12 = vsel %vm46_vm0, %v45_v6, %v1895_v0  ;;  %v287_v13 = vrot.slane %v1912_v10, 7  ;;  %v1927_v14 = vld.sshfl [vmem:[#allocation2 + $0x10] sm:$0x1 pattern:$0x76325410] }
  0x83   :  { %v1645_v15 = vsel %vm52_vm3, %v1641_v63, %v1644_v11  ;;  %v49_v16 = vsel %vm48_vm1, %v45_v6, %v47_v12  ;;  %v1928_v17 = vld.sshfl [vmem:[#allocation2 + $0x50] sm:$0x1 pattern:$0x76325410] }
  0x84   :  { %1646 = vrot.lane.b32.xlu0 %v1645_v15, %s2087_s18  ;;  %v51_v18 = vsel %vm50_vm2, %v45_v6, %v49_v16  ;;  %v288_v19 = vsel %vm46_vm0, %v287_v13, %v1911_v7  ;;  %v518_v20 = vrot.slane %v1928_v17, 7  ;;  %v1943_v21 = vld.sshfl [vmem:[#allocation2 + $0x18] sm:$0x1 pattern:$0x76325410] }
  0x85   :  { %v53_v22 = vsel %vm52_vm3, %v45_v6, %v51_v18  ;;  %v289_v23 = vsel %vm48_vm1, %v287_v13, %v288_v19  ;;  %v1944_v24 = vld.sshfl [vmem:[#allocation2 + $0x58] sm:$0x1 pattern:$0x76325410] }
  0x86   :  { %56 = vst.msk [vmem:[#allocation5] sm:$0x3] %vm55_vm4, %v53_v22  ;;  %v290_v25 = vsel %vm50_vm2, %v287_v13, %v289_v23  ;;  %v519_v26 = vsel %vm46_vm0, %v518_v20, %v1927_v14  ;;  %v748_v27 = vrot.slane %v1944_v24, 7 }
  0x87   :  { %v1975_v28 = vld.sshfl [vmem:[#allocation2 + $0x28] sm:$0x1 pattern:$0x76325410]  ;;  %v291_v29 = vsel %vm52_vm3, %v287_v13, %v290_v25  ;;  %v520_v30 = vsel %vm48_vm1, %v518_v20, %v519_v26 }
  0x88   :  { %v1976_v31 = vld.sshfl [vmem:[#allocation2 + $0x68] sm:$0x1 pattern:$0x76325410]  ;;  %v143_v32 = vpop.permute.xlu1 %142  ;;  %293 = vst.msk [vmem:[#allocation5 + $0x2] sm:$0x3] %vm55_vm4, %v291_v29  ;;  %v521_v33 = vsel %vm50_vm2, %v518_v20, %v520_v30  ;;  %v749_v34 = vsel %vm46_vm0, %v748_v27, %v1943_v21 }
  0x89   :  { %v1209_v35 = vrot.slane %v1976_v31, 7  ;;  %v1959_v36 = vld.sshfl [vmem:[#allocation2 + $0x20] sm:$0x1 pattern:$0x76325410]  ;;  %v522_v37 = vsel %vm52_vm3, %v518_v20, %v521_v33  ;;  %v750_v38 = vsel %vm48_vm1, %v748_v27, %v749_v34 }
  0x8a   :  { %v1960_v39 = vld.sshfl [vmem:[#allocation2 + $0x60] sm:$0x1 pattern:$0x76325410]  ;;  %v83_v40 = vpop.permute.xlu0 %82  ;;  %524 = vst.msk [vmem:[#allocation5 + $0x4] sm:$0x3] %vm55_vm4, %v522_v37  ;;  %v751_v41 = vsel %vm50_vm2, %v748_v27, %v750_v38 }
  0x8b   :  { %v1210_v42 = vsel %vm46_vm0, %v1209_v35, %v1975_v28  ;;  %v979_v43 = vrot.slane %v1960_v39, 7  ;;  %v2007_v44 = vld.sshfl [vmem:[#allocation2 + $0x38] sm:$0x1 pattern:$0x76325410]  ;;  %v752_v45 = vsel %vm52_vm3, %v748_v27, %v751_v41 }
  0x8c   :  { %86 = vst.msk [vmem:[#allocation5] sm:$0x3] %vm85_vm5, %v83_v40  ;;  %v1211_v46 = vsel %vm48_vm1, %v1209_v35, %v1210_v42  ;;  %v2008_v47 = vld.sshfl [vmem:[#allocation2 + $0x78] sm:$0x1 pattern:$0x76325410]  ;;  %v173_v48 = vpop.permute.xlu1 %172 }
  0x8d   :  { %754 = vst.msk [vmem:[#allocation5 + $0x6] sm:$0x3] %vm55_vm4, %v752_v45  ;;  %v1212_v49 = vsel %vm50_vm2, %v1209_v35, %v1211_v46  ;;  %v980_v50 = vsel %vm46_vm0, %v979_v43, %v1959_v36  ;;  %v1670_v51 = vrot.slane %v2008_v47, 7 }
  0x8e   :  { %v1991_v52 = vld.sshfl [vmem:[#allocation2 + $0x30] sm:$0x1 pattern:$0x76325410]  ;;  %v1213_v53 = vsel %vm52_vm3, %v1209_v35, %v1212_v49  ;;  %v981_v54 = vsel %vm48_vm1, %v979_v43, %v980_v50  ;;  %v113_v56 = vpop.permute.xlu0 %112 }
  0x8f   :  { %v1992_v55 = vld.sshfl [vmem:[#allocation2 + $0x70] sm:$0x1 pattern:$0x76325410]  ;;  %1215 = vst.msk [vmem:[#allocation5 + $0xa] sm:$0x3] %vm55_vm4, %v1213_v53  ;;  %v982_v57 = vsel %vm50_vm2, %v979_v43, %v981_v54  ;;  %v1671_v58 = vsel %vm46_vm0, %v1670_v51, %v2007_v44 }
  0x90   :  { %v1440_v59 = vrot.slane %v1992_v55, 7  ;;  %116 = vst.msk [vmem:[#allocation5] sm:$0x3] %vm115_vm6, %v113_v56  ;;  %v983_v60 = vsel %vm52_vm3, %v979_v43, %v982_v57  ;;  %v1672_v61 = vsel %vm48_vm1, %v1670_v51, %v1671_v58  ;;  %v233_v62 = vpop.permute.xlu1 %232 }
  0x91   :  { %146 = vst.msk [vmem:[#allocation5] sm:$0x3] %vm145_vm7, %v143_v32  ;;  %v1673_v63 = vsel %vm50_vm2, %v1670_v51, %v1672_v61 }
  0x92   :  { %985 = vst.msk [vmem:[#allocation5 + $0x8] sm:$0x3] %vm55_vm4, %v983_v60  ;;  %v1441_v0 = vsel %vm46_vm0, %v1440_v59, %v1991_v52  ;;  %v1674_v1 = vsel %vm52_vm3, %v1670_v51, %v1673_v63  ;;  %v203_v3 = vpop.permute.xlu0 %202 }
  0x93   :  { %176 = vst.msk [vmem:[#allocation5] sm:$0x3] %vm175_vm8, %v173_v48  ;;  %v1442_v2 = vsel %vm48_vm1, %v1440_v59, %v1441_v0 }
  0x94   :  { %1676 = vst.msk [vmem:[#allocation5 + $0xe] sm:$0x3] %vm55_vm4, %v1674_v1  ;;  %v1443_v4 = vsel %vm50_vm2, %v1440_v59, %v1442_v2  ;;  %v320_v6 = vpop.permute.xlu1 %319 }
  0x95   :  { %206 = vst.msk [vmem:[#allocation5] sm:$0x3] %vm205_vm9, %v203_v3  ;;  %v1444_v5 = vsel %vm52_vm3, %v1440_v59, %v1443_v4 }
  0x96   :  { %236 = vst.msk [vmem:[#allocation5] sm:$0x3] %vm235_vm10, %v233_v62  ;;  %v263_v7 = vpop.permute.xlu0 %262 }
  0x97   :  { %1446 = vst.msk [vmem:[#allocation5 + $0xc] sm:$0x3] %vm55_vm4, %v1444_v5 }
  0x98   :  { %322 = vst.msk [vmem:[#allocation5 + $0x2] sm:$0x3] %vm85_vm5, %v320_v6  ;;  %v378_v8 = vpop.permute.xlu1 %377 }
  0x99   :  { %266 = vst.msk [vmem:[#allocation5] sm:$0x3] %vm265_vm11, %v263_v7 }
  0x9a   :  { %v349_v9 = vpop.permute.xlu0 %348 }
  0x9b   :  { %351 = vst.msk [vmem:[#allocation5 + $0x2] sm:$0x3] %vm115_vm6, %v349_v9 }
  0x9c   :  { %380 = vst.msk [vmem:[#allocation5 + $0x2] sm:$0x3] %vm145_vm7, %v378_v8  ;;  %v436_v10 = vpop.permute.xlu1 %435 }
  0x9e   :  { %v407_v11 = vpop.permute.xlu0 %406 }
  0x9f   :  { %409 = vst.msk [vmem:[#allocation5 + $0x2] sm:$0x3] %vm175_vm8, %v407_v11 }
  0xa0   :  { %438 = vst.msk [vmem:[#allocation5 + $0x2] sm:$0x3] %vm205_vm9, %v436_v10  ;;  %v494_v12 = vpop.permute.xlu1 %493 }
  0xa2   :  { %v465_v13 = vpop.permute.xlu0 %464 }
  0xa3   :  { %467 = vst.msk [vmem:[#allocation5 + $0x2] sm:$0x3] %vm235_vm10, %v465_v13 }
  0xa4   :  { %496 = vst.msk [vmem:[#allocation5 + $0x2] sm:$0x3] %vm265_vm11, %v494_v12  ;;  %v580_v14 = vpop.permute.xlu1 %579 }
  0xa6   :  { %v551_v15 = vpop.permute.xlu0 %550 }
  0xa7   :  { %553 = vst.msk [vmem:[#allocation5 + $0x4] sm:$0x3] %vm85_vm5, %v551_v15 }
  0xa8   :  { %582 = vst.msk [vmem:[#allocation5 + $0x4] sm:$0x3] %vm115_vm6, %v580_v14  ;;  %v638_v16 = vpop.permute.xlu1 %637 }
  0xaa   :  { %v609_v17 = vpop.permute.xlu0 %608 }
  0xab   :  { %611 = vst.msk [vmem:[#allocation5 + $0x4] sm:$0x3] %vm145_vm7, %v609_v17 }
  0xac   :  { %640 = vst.msk [vmem:[#allocation5 + $0x4] sm:$0x3] %vm175_vm8, %v638_v16  ;;  %v696_v18 = vpop.permute.xlu1 %695 }
  0xae   :  { %v667_v19 = vpop.permute.xlu0 %666 }
  0xaf   :  { %669 = vst.msk [vmem:[#allocation5 + $0x4] sm:$0x3] %vm205_vm9, %v667_v19 }
  0xb0   :  { %698 = vst.msk [vmem:[#allocation5 + $0x4] sm:$0x3] %vm235_vm10, %v696_v18  ;;  %v781_v20 = vpop.permute.xlu1 %780 }
  0xb1   :  { %783 = vst.msk [vmem:[#allocation5 + $0x6] sm:$0x3] %vm85_vm5, %v781_v20 }
  0xb2   :  { %v725_v21 = vpop.permute.xlu0 %724 }
  0xb3   :  { %727 = vst.msk [vmem:[#allocation5 + $0x4] sm:$0x3] %vm265_vm11, %v725_v21 }
  0xb4   :  { %v839_v22 = vpop.permute.xlu1 %838 }
  0xb6   :  { %v810_v23 = vpop.permute.xlu0 %809 }
  0xb7   :  { %812 = vst.msk [vmem:[#allocation5 + $0x6] sm:$0x3] %vm115_vm6, %v810_v23 }
  0xb8   :  { %841 = vst.msk [vmem:[#allocation5 + $0x6] sm:$0x3] %vm145_vm7, %v839_v22  ;;  %v1242_v24 = vpop.permute.xlu1 %1241 }
  0xb9   :  { %1244 = vst.msk [vmem:[#allocation5 + $0xa] sm:$0x3] %vm85_vm5, %v1242_v24 }
  0xba   :  { %v1012_v25 = vpop.permute.xlu0 %1011 }
  0xbb   :  { %1014 = vst.msk [vmem:[#allocation5 + $0x8] sm:$0x3] %vm85_vm5, %v1012_v25 }
  0xbc   :  { %v1703_v26 = vpop.permute.xlu1 %1702 }
  0xbd   :  { %1705 = vst.msk [vmem:[#allocation5 + $0xe] sm:$0x3] %vm85_vm5, %v1703_v26 }
  0xbe   :  { %v1473_v27 = vpop.permute.xlu0 %1472 }
  0xbf   :  { %1475 = vst.msk [vmem:[#allocation5 + $0xc] sm:$0x3] %vm85_vm5, %v1473_v27 }
  0xc0   :  { %v1271_v28 = vpop.permute.xlu1 %1270 }
  0xc1   :  { %1273 = vst.msk [vmem:[#allocation5 + $0xa] sm:$0x3] %vm115_vm6, %v1271_v28 }
  0xc2   :  { %v1041_v29 = vpop.permute.xlu0 %1040 }
  0xc3   :  { %1043 = vst.msk [vmem:[#allocation5 + $0x8] sm:$0x3] %vm115_vm6, %v1041_v29 }
  0xc4   :  { %v1732_v30 = vpop.permute.xlu1 %1731 }
  0xc5   :  { %1734 = vst.msk [vmem:[#allocation5 + $0xe] sm:$0x3] %vm115_vm6, %v1732_v30 }
  0xc6   :  { %v1502_v31 = vpop.permute.xlu0 %1501 }
  0xc7   :  { %1504 = vst.msk [vmem:[#allocation5 + $0xc] sm:$0x3] %vm115_vm6, %v1502_v31 }
  0xc8   :  { %v1300_v32 = vpop.permute.xlu1 %1299 }
  0xc9   :  { %1302 = vst.msk [vmem:[#allocation5 + $0xa] sm:$0x3] %vm145_vm7, %v1300_v32 }
  0xca   :  { %v1070_v33 = vpop.permute.xlu0 %1069 }
  0xcb   :  { %1072 = vst.msk [vmem:[#allocation5 + $0x8] sm:$0x3] %vm145_vm7, %v1070_v33 }
  0xcc   :  { %v1761_v34 = vpop.permute.xlu1 %1760 }
  0xcd   :  { %1763 = vst.msk [vmem:[#allocation5 + $0xe] sm:$0x3] %vm145_vm7, %v1761_v34 }
  0xce   :  { %v1531_v35 = vpop.permute.xlu0 %1530 }
  0xcf   :  { %1533 = vst.msk [vmem:[#allocation5 + $0xc] sm:$0x3] %vm145_vm7, %v1531_v35 }
  0xd0   :  { %v1099_v36 = vpop.permute.xlu1 %1098 }
  0xd1   :  { %1101 = vst.msk [vmem:[#allocation5 + $0x8] sm:$0x3] %vm175_vm8, %v1099_v36 }
  0xd2   :  { %v868_v37 = vpop.permute.xlu0 %867 }
  0xd3   :  { %870 = vst.msk [vmem:[#allocation5 + $0x6] sm:$0x3] %vm175_vm8, %v868_v37 }
  0xd4   :  { %v1560_v38 = vpop.permute.xlu1 %1559 }
  0xd5   :  { %1562 = vst.msk [vmem:[#allocation5 + $0xc] sm:$0x3] %vm175_vm8, %v1560_v38 }
  0xd6   :  { %v1329_v39 = vpop.permute.xlu0 %1328 }
  0xd7   :  { %1331 = vst.msk [vmem:[#allocation5 + $0xa] sm:$0x3] %vm175_vm8, %v1329_v39 }
  0xd8   :  { %v897_v40 = vpop.permute.xlu1 %896 }
  0xd9   :  { %899 = vst.msk [vmem:[#allocation5 + $0x6] sm:$0x3] %vm205_vm9, %v897_v40 }
  0xda   :  { %v1790_v41 = vpop.permute.xlu0 %1789 }
  0xdb   :  { %1792 = vst.msk [vmem:[#allocation5 + $0xe] sm:$0x3] %vm175_vm8, %v1790_v41 }
  0xdc   :  { %v1358_v42 = vpop.permute.xlu1 %1357 }
  0xdd   :  { %1360 = vst.msk [vmem:[#allocation5 + $0xa] sm:$0x3] %vm205_vm9, %v1358_v42 }
  0xde   :  { %v1128_v43 = vpop.permute.xlu0 %1127 }
  0xdf   :  { %1130 = vst.msk [vmem:[#allocation5 + $0x8] sm:$0x3] %vm205_vm9, %v1128_v43 }
  0xe0   :  { %v1819_v44 = vpop.permute.xlu1 %1818 }
  0xe1   :  { %1821 = vst.msk [vmem:[#allocation5 + $0xe] sm:$0x3] %vm205_vm9, %v1819_v44 }
  0xe2   :  { %v1589_v45 = vpop.permute.xlu0 %1588 }
  0xe3   :  { %1591 = vst.msk [vmem:[#allocation5 + $0xc] sm:$0x3] %vm205_vm9, %v1589_v45 }
  0xe4   :  { %v1157_v46 = vpop.permute.xlu1 %1156 }
  0xe5   :  { %1159 = vst.msk [vmem:[#allocation5 + $0x8] sm:$0x3] %vm235_vm10, %v1157_v46 }
  0xe6   :  { %v926_v47 = vpop.permute.xlu0 %925 }
  0xe7   :  { %928 = vst.msk [vmem:[#allocation5 + $0x6] sm:$0x3] %vm235_vm10, %v926_v47 }
  0xe8   :  { %v1618_v48 = vpop.permute.xlu1 %1617 }
  0xe9   :  { %1620 = vst.msk [vmem:[#allocation5 + $0xc] sm:$0x3] %vm235_vm10, %v1618_v48 }
  0xea   :  { %v1387_v49 = vpop.permute.xlu0 %1386 }
  0xeb   :  { %1389 = vst.msk [vmem:[#allocation5 + $0xa] sm:$0x3] %vm235_vm10, %v1387_v49 }
  0xec   :  { %v955_v50 = vpop.permute.xlu1 %954 }
  0xed   :  { %957 = vst.msk [vmem:[#allocation5 + $0x6] sm:$0x3] %vm265_vm11, %v955_v50 }
  0xee   :  { %v1848_v51 = vpop.permute.xlu0 %1847 }
  0xef   :  { %1850 = vst.msk [vmem:[#allocation5 + $0xe] sm:$0x3] %vm235_vm10, %v1848_v51 }
  0xf0   :  { %v1416_v52 = vpop.permute.xlu1 %1415 }
  0xf1   :  { %1418 = vst.msk [vmem:[#allocation5 + $0xa] sm:$0x3] %vm265_vm11, %v1416_v52 }
  0xf2   :  { %v1186_v53 = vpop.permute.xlu0 %1185 }
  0xf3   :  { %1188 = vst.msk [vmem:[#allocation5 + $0x8] sm:$0x3] %vm265_vm11, %v1186_v53 }
  0xf4   :  { %v1877_v54 = vpop.permute.xlu1 %1876 }
  0xf5   :  { %1879 = vst.msk [vmem:[#allocation5 + $0xe] sm:$0x3] %vm265_vm11, %v1877_v54 }
  0xf6   :  { %v1647_v55 = vpop.permute.xlu0 %1646 }
  0xf7   :  { %1649 = vst.msk [vmem:[#allocation5 + $0xc] sm:$0x3] %vm265_vm11, %v1647_v55 }
  0xf8   :  { %2065 = shalt.err (!%p2062_p9)
}
  0xf9   :  { %1889 = dma.vmem_to_hbm [thread:$0]  %s1887_s20, 256, %s2482_s1, [#allocation4]  }
  0xfa   :  { %2076 = dma.done.wait [#allocation4], 256  }
  0xfb   :  { %2077 = vsyncadd [#allocation4], 4294967040 }
  0xfc   :  { %1893 = vsyncpa [#allocation3], 1 }
  0xfd   :  { %1894 = vsyncpa [#allocation4], 1 }

</bundles_post_ra>
